<compile_context>
chip_gen: v5e
topology: v5e:2x2
jax: 0.10.0
libtpu: 0.0.40
codegen_flags: <defaults>
</compile_context>

<pallas_src>
import jax
import jax.numpy as jnp
from jax.experimental import pallas as pl
from jax.experimental.pallas import tpu as pltpu

IN_FEATURES = 12
HIDDEN = 10
OUT_FEATURES = 3

GROUP = 128                       # original rows packed per lane-dense slab row
XW = GROUP * IN_FEATURES          # 1536 (input slab width,  12 x 128 lanes)
YW = GROUP * OUT_FEATURES         # 384  (output slab width,  3 x 128 lanes)

SMALL_BATCH_THRESHOLD = 16384     # below this, plain XLA beats a kernel launch


# ----------------------------------------------------------------------------
# Kernel
# ----------------------------------------------------------------------------
def fused_linear_kernel(x_ref, w_ref, b_ref, o_ref):
    # One lane-dense MXU pass per tile: (TG, 1536) @ (1536, 384) + bias.
    y = jnp.dot(x_ref[...], w_ref[...], preferred_element_type=jnp.float32)
    o_ref[...] = (y + b_ref[...]).astype(o_ref.dtype)


# ----------------------------------------------------------------------------
# One-time parameter preparation (off the hot path)
# ----------------------------------------------------------------------------
def fuse_params(w1, b1, w2, b2):
    """Fuse the two Linear layers.

    w1: (10, 12), b1: (10,), w2: (3, 10), b2: (3,)   (PyTorch: y = x @ W.T + b)
    Returns w_fused: (12, 3), b_fused: (3,).
    """
    w_fused = w1.T @ w2.T            # (12, 3)
    b_fused = b1 @ w2.T + b2         # (3,)
    return w_fused, b_fused


def expand_params(w_fused, b_fused, group=GROUP):
    """Block-diagonal expansion for the lane-dense grouped layout.

    w_bd[g*12 + k, h*3 + n] = w_fused[k, n] if g == h else 0.
    """
    eye = jnp.eye(group, dtype=w_fused.dtype)
    w_bd = jnp.einsum("gh,kn->gkhn", eye, w_fused).reshape(
        group * IN_FEATURES, group * OUT_FEATURES)
    b_bd = jnp.tile(b_fused, group).reshape(1, group * OUT_FEATURES)
    return w_bd, b_bd


# ----------------------------------------------------------------------------
# Pallas forward (large batches)
# ----------------------------------------------------------------------------
def _pick_block_groups(num_groups):
    # Each group-row carries 6 KiB of x + 1.5 KiB of y (f32).  256 group-rows
    # per step ~= 1.9 MiB of HBM traffic, comfortably amortizing the ~0.35 us
    # per-step overhead.  Double-buffered VMEM at tg=256:
    #   x 2*1.5 MiB + y 2*0.375 MiB + weight 2*2.25 MiB ~= 8.3 MiB.
    # Keep >= 2 grid steps so v7x's two TensorCores both get work.
    tg = min(256, max(8, num_groups // 2))
    tg = max(8, (tg // 8) * 8)       # sublane (8) alignment on the group axis
    return tg


def nnet_forward_pallas(x, w_bd, b_bd, *, block_groups=None):
    """x: (B, 12) float32 -> (B, 3) float32 via the lane-dense Pallas kernel."""
    B = x.shape[0]
    ng = -(-B // GROUP)                                  # ceil(B / 128)
    tg = _pick_block_groups(ng) if block_groups is None else block_groups
    ng_pad = -(-ng // tg) * tg
    b_pad = ng_pad * GROUP

    if b_pad != B:
        x = jnp.pad(x, ((0, b_pad - B), (0, 0)))

    # Free contiguous reshape to lane-dense slabs: (B_pad, 12) -> (ng_pad, 1536)
    xg = x.reshape(ng_pad, XW)

    out_g = pl.pallas_call(
        fused_linear_kernel,
        out_shape=jax.ShapeDtypeStruct((ng_pad, YW), x.dtype),
        grid=(ng_pad // tg,),
        in_specs=[
            pl.BlockSpec((tg, XW), lambda i: (i, 0)),    # x slab: tiled over batch
            pl.BlockSpec((XW, YW), lambda i: (0, 0)),    # block-diag weight: resident
            pl.BlockSpec((1, YW), lambda i: (0, 0)),     # tiled bias: resident
        ],
        out_specs=pl.BlockSpec((tg, YW), lambda i: (i, 0)),
        compiler_params=pltpu.CompilerParams(
            dimension_semantics=("parallel",),           # v7x: split batch across TCs
            vmem_limit_bytes=32 * 1024 * 1024,
        ),
    )(xg, w_bd, b_bd)

    out = out_g.reshape(b_pad, OUT_FEATURES)
    return out[:B] if b_pad != B else out


# ----------------------------------------------------------------------------
# Dispatcher: tiny batches go straight to fused XLA
# ----------------------------------------------------------------------------
def nnet_forward(x, params):
    w_fused, b_fused, w_bd, b_bd = params
    if x.shape[0] < SMALL_BATCH_THRESHOLD:
        return x @ w_fused + b_fused
    return nnet_forward_pallas(x, w_bd, b_bd)


# ----------------------------------------------------------------------------
# Init / reference
# ----------------------------------------------------------------------------
def init_params(key):
    # Mimics nn.Linear's uniform(-1/sqrt(fan_in), +1/sqrt(fan_in)) init.
    k1, k2, k3, k4 = jax.random.split(key, 4)
    bound1 = 1.0 / (IN_FEATURES ** 0.5)
    bound2 = 1.0 / (HIDDEN ** 0.5)
    w1 = jax.random.uniform(k1, (HIDDEN, IN_FEATURES), jnp.float32, -bound1, bound1)
    b1 = jax.random.uniform(k2, (HIDDEN,), jnp.float32, -bound1, bound1)
    w2 = jax.random.uniform(k3, (OUT_FEATURES, HIDDEN), jnp.float32, -bound2, bound2)
    b2 = jax.random.uniform(k4, (OUT_FEATURES,), jnp.float32, -bound2, bound2)
    return w1, b1, w2, b2


def _reference(x, w1, b1, w2, b2):
    # Plain-JAX reference matching the PyTorch forward.
    return (x @ w1.T + b1) @ w2.T + b2


if __name__ == "__main__":
    key = jax.random.PRNGKey(0)
    kp, kx0, kx1, kx2 = jax.random.split(key, 4)
    w1, b1, w2, b2 = init_params(kp)

    # One-time parameter prep (off the hot path).
    w_fused, b_fused = fuse_params(w1, b1, w2, b2)
    w_bd, b_bd = expand_params(w_fused, b_fused)
    params = (w_fused, b_fused, w_bd, b_bd)

    # 1) Tiny batch: dispatcher takes the fused-XLA fast path.
    x0 = jax.random.normal(kx0, (8, IN_FEATURES), jnp.float32)
    out0 = jax.block_until_ready(nnet_forward(x0, params))
    assert out0.shape == (8, OUT_FEATURES)
    assert jnp.allclose(out0, _reference(x0, w1, b1, w2, b2), atol=1e-5, rtol=1e-4)

    # 2) Pallas path, batch divisible by GROUP (16 group-rows -> 2 grid steps).
    x1 = jax.random.normal(kx1, (2048, IN_FEATURES), jnp.float32)
    out1 = jax.block_until_ready(nnet_forward_pallas(x1, w_bd, b_bd))
    assert out1.shape == (2048, OUT_FEATURES)
    assert jnp.allclose(out1, _reference(x1, w1, b1, w2, b2), atol=1e-5, rtol=1e-4)

    # 3) Pallas path, ragged batch (exercises the pad + slice path).
    x2 = jax.random.normal(kx2, (1000, IN_FEATURES), jnp.float32)
    out2 = jax.block_until_ready(nnet_forward_pallas(x2, w_bd, b_bd))
    assert out2.shape == (1000, OUT_FEATURES)
    assert jnp.allclose(out2, _reference(x2, w1, b1, w2, b2), atol=1e-5, rtol=1e-4)

    print("KERNEL_OK")
</pallas_src>

<mosaic_0001>
module attributes {stable_mosaic.version = 11 : i64} {
  func.func @fused_linear_kernel(%arg0: i32, %arg1: memref<8x1536xf32, #tpu.memory_space<vmem>>, %arg2: memref<1536x384xf32, #tpu.memory_space<vmem>>, %arg3: memref<1x384xf32, #tpu.memory_space<vmem>>, %arg4: memref<8x384xf32, #tpu.memory_space<vmem>>) attributes {dimension_semantics = [#tpu.dimension_semantics<parallel>], iteration_bounds = array<i64: 2>, scalar_prefetch = 0 : i64, scratch_operands = 0 : i64, tpu.core_type = #tpu.core_type<tc>, window_params = [{transform_indices = @transform_0, window_bounds = array<i64: 8, 1536>}, {pipeline_mode = #tpu.pipeline_mode<synchronous>, transform_indices = @transform_1, window_bounds = array<i64: 1536, 384>}, {pipeline_mode = #tpu.pipeline_mode<synchronous>, transform_indices = @transform_2, window_bounds = array<i64: 1, 384>}, {transform_indices = @transform_3, window_bounds = array<i64: 8, 384>}]} {
    %c0 = arith.constant 0 : index
    %c0_0 = arith.constant 0 : index
    %0 = vector.load %arg1[%c0, %c0_0] : memref<8x1536xf32, #tpu.memory_space<vmem>>, vector<8x1536xf32>
    %c0_1 = arith.constant 0 : index
    %c0_2 = arith.constant 0 : index
    %1 = vector.load %arg2[%c0_1, %c0_2] : memref<1536x384xf32, #tpu.memory_space<vmem>>, vector<1536x384xf32>
    %cst = arith.constant dense<0.000000e+00> : vector<8x384xf32>
    %2 = tpu.matmul %0, %1, %cst {dimension_numbers = #tpu.dot_dimension_numbers<[1], [0], [0], [1], [0, 0, 1, 1], [], []>} : vector<8x1536xf32>, vector<1536x384xf32>, vector<8x384xf32> -> vector<8x384xf32>
    %c0_3 = arith.constant 0 : index
    %c0_4 = arith.constant 0 : index
    %3 = vector.load %arg3[%c0_3, %c0_4] : memref<1x384xf32, #tpu.memory_space<vmem>>, vector<1x384xf32>
    %4 = vector.broadcast %3 : vector<1x384xf32> to vector<8x384xf32>
    %5 = arith.addf %2, %4 : vector<8x384xf32>
    %c0_5 = arith.constant 0 : index
    %c0_6 = arith.constant 0 : index
    %6 = vector.load %arg4[%c0_5, %c0_6] : memref<8x384xf32, #tpu.memory_space<vmem>>, vector<8x384xf32>
    tpu.vector_store %arg4[%c0_5, %c0_6], %5 {strides = array<i32>} : memref<8x384xf32, #tpu.memory_space<vmem>>, vector<8x384xf32>,
    return
  }
  func.func @transform_0(%arg0: i32) -> (i32, i32) {
    %c0_i32 = arith.constant 0 : i32
    %c0_i32_0 = arith.constant 0 : i32
    return %arg0, %c0_i32 : i32, i32
  }
  func.func @transform_1(%arg0: i32) -> (i32, i32) {
    %c0_i32 = arith.constant 0 : i32
    %c0_i32_0 = arith.constant 0 : i32
    %c0_i32_1 = arith.constant 0 : i32
    return %c0_i32, %c0_i32_0 : i32, i32
  }
  func.func @transform_2(%arg0: i32) -> (i32, i32) {
    %c0_i32 = arith.constant 0 : i32
    %c0_i32_0 = arith.constant 0 : i32
    %c0_i32_1 = arith.constant 0 : i32
    return %c0_i32, %c0_i32_0 : i32, i32
  }
  func.func @transform_3(%arg0: i32) -> (i32, i32) {
    %c0_i32 = arith.constant 0 : i32
    %c0_i32_0 = arith.constant 0 : i32
    return %arg0, %c0_i32 : i32, i32
  }
}

</mosaic_0001>

<bundles_post_ra>
// kernel: tpu_custom_call.1
= control target key start
LH: loop header
LB: loop body
LE: loop exit
PB: predicated region body
PF: predicated region fallthrough
CT: control target
= control target key end

     0   :  { %8 = vsyncpa [#allocation3], 0  ;;  %s2156_s0 = inlined_call_operand.hbm [shape: f32[16,1536], index: 0, kind: input, shape index: {}]   ;;  %s2157_s1 = inlined_call_operand.hbm [shape: f32[1536,384], index: 1, kind: input, shape index: {}]   ;;  %s2158_s2 = inlined_call_operand.hbm [shape: f32[1,384], index: 2, kind: input, shape index: {}]   ;;  %s2159_s3 = inlined_call_operand.hbm [shape: f32[16,384], index: 3, kind: output, shape index: {}]  }
   0x1   :  { %10 = vsyncpa [#allocation3 + $0x1], 0 }
   0x2   :  { %11 = vsyncpa [#allocation6], 0 }
   0x3   :  { %12 = vsyncpa [#allocation4], 0 }
   0x4   :  { %14 = vsyncpa [#allocation4 + $0x1], 0  ;;  %s1929_s12 = smov 0   ;;  %s1931_s13 = smov 0  }
   0x5   :  { %s1933_s14 = smov 0   ;;  %s1935_s15 = smov 0  }
   0x6 LB: > { %s130_s18 = sshll.u32 %s2157_s1, 4  ;;  %s1953_s19 = sadd.s32 4294967295, %s1903_s15   ;;  %s1903_s15 = sphi %s1935_s15, %s2169_s15   ;;  %s1899_s14 = sphi %s1933_s14, %s2168_s14   ;;  %s1895_s13 = sphi %s1931_s13, %s2167_s13   ;;  %s1891_s12 = sphi %s1929_s12, %s2166_s12   ;;  %s131_s18 = int_to_ptr.hbm [resolvable:$true] %s130_s18 }
   0x7   : > { %p1646_p0 = scmp.ge.s32.totalorder %s1903_s15, 1  ;;  %p41_p1 = scmp.eq.s32.totalorder %s1953_s19, 0 }
   0x8   : > { %p119_p2 = scmp.lt.s32.totalorder %s1903_s15, 3  ;;  %s1905_s21 = smov [#allocation5]  }
   0x9   : > { %s132_s22 = sshll.u32 %s1905_s21, 4  ;;  %s145_s25 = sshll.u32 %s2158_s2, 4  ;;  %s133_s22 = int_to_ptr.vmem [resolvable:$true] %s132_s22  ;;  %s146_s25 = int_to_ptr.hbm [resolvable:$true] %s145_s25 }
   0xa   : > { %p1958_p3 = pnand %p1646_p0, %p119_p2  ;;  %s1906_s26 = smov [#allocation7]  }
   0xb   : > { %s147_s27 = sshll.u32 %s1906_s26, 4  ;;  %s1907_s28 = smov 384   ;;  %s148_s27 = int_to_ptr.vmem [resolvable:$true] %s147_s27 }
   0xc   : > { %p1674_p4 = pneg %p1958_p3  ;;  %s1908_s29 = smov 24  }
   0xd   : > { %s1645_s30 = sadd.s32 4294967294, %s1903_s15   ;;  %s1972_s4 = sadd.s32 1, %s1903_s15  }
   0xe   : > { %p1675_p6 = pnand %p1674_p4, %p41_p1  ;;  %s24_s5 = ssub.s32 %s1903_s15, %s1972_s4 }
   0xf   : > { %s27_s6 = sadd.s32 1, %s1899_s14  ;;  %p25_p7 = scmp.eq.s32.totalorder %s24_s5, 0 }
  0x10   : > { %1677 = dma.hbm_to_vmem [thread:$0]  (!%p1675_p6), %s131_s18, 73728, %s133_s22, [#allocation6], %s1907_s28, %s1907_s28, %s1908_s29  }
  0x11   : > { %1680 = dma.hbm_to_vmem [thread:$0]  (!%p1675_p6), %s146_s25, 48, %s148_s27, [#allocation6]  }
  0x12   : > { %p34_p8 = scmp.ne.s32.totalorder %s1899_s14, %s1895_s13  ;;  %p35_p9 = scmp.eq.s32.totalorder %s1903_s15, 0 }
  0x13   : > { %p40_p10 = scmp.ne.s32.totalorder %s1895_s13, %s1891_s12  ;;  %p106_p13 = scmp.eq.s32.totalorder %s1953_s19, 1 }
  0x14   : > { %s1983_s7 = scalar_select %p25_p7, %s1899_s14, %s27_s6  }
  0x15   : > { %p36_p11 = por %p35_p9, %p34_p8  ;;  %p1987_p12 = por %p41_p1, %p40_p10 }
  0x16   : > { %p112_p0 = scmp.eq.s32.totalorder %s1645_s30, 1  ;;  %p1691_p2 = scmp.lt.s32.totalorder %s1903_s15, 2 }
  0x17   : > { %s158_s9 = sand.u32 1, %s1899_s14   ;;  %p1994_p4 = por %p106_p13, %p34_p8 }
  0x18   : > { %p1998_p6 = por %p112_p0, %p40_p10  ;;  %s1657_s16 = smul.u32 96, %s158_s9 }
  0x19   : > { %s1658_s17 = smul.u32 96, %s1903_s15  ;;  %p2003_p7 = pnand %p1691_p2, %p36_p11 }
  0x1a   : > { %s162_s24 = scalar_lea.vmem [#allocation2], %s1657_s16  ;;  %s159_s27 = scalar_lea.sflag [#allocation3], %s158_s9 }
  0x1b   : > { %s167_s23 = scalar_lea.hbm %s2156_s0, %s1658_s17  ;;  %s171_s25 = sshll.u32 %s162_s24, 4  ;;  %s172_s25 = int_to_ptr.vmem [resolvable:$true] %s171_s25 }
  0x1c   : > { %s169_s26 = sshll.u32 %s167_s23, 4  ;;  %p1807_p9 = pneg %p2003_p7  ;;  %s170_s26 = int_to_ptr.hbm [resolvable:$true] %s169_s26 }
  0x1d   : > { %s1803_s28 = sshra.s32 %s170_s26, 4  ;;  %s1810_s6 = scalar_lea.hbm %s2156_s0, 192  ;;  %s1804_s28 = int_to_ptr.hbm [resolvable:$true] %s1803_s28 }
  0x1e   : > { %s1805_s29 = scalar_lea.hbm %s1804_s28, 96  ;;  %p1811_p13 = scmp.lt.s32.totalorder %s1804_s28, %s2156_s0 }
  0x1f   : > { %p1806_p8 = scmp.ne.s32.totalorder %s1804_s28, %s1805_s29  ;;  %p1812_p0 = scmp.lt.s32.totalorder %s1810_s6, %s1805_s29 }
  0x21   : > { %p1808_p10 = pnand %p1807_p9, %p1806_p8  ;;  %p1813_p2 = por %p1812_p0, %p1811_p13 }
  0x23   : > { %p1809_p11 = pneg %p1808_p10 }
  0x25   : > { %p1814_p5 = pnand %p1813_p2, %p1809_p11 }
  0x27   : > { %1817 = shalt.err (!%p1814_p5)
}
  0x28   : > { %1684 = dma.hbm_to_vmem [thread:$0]  (!%p2003_p7), %s170_s26, 1536, %s172_s25, %s159_s27  }
  0x29   : > { %180 = sbr.rel (%p1958_p3) target bundleno = 493 (0x1ed), region = 32  ;;  %s2023_s9 = sand.u32 (!%p1958_p3), 1, %s1895_s13  }
  0x2a   : > { %s1659_s16 = smul.u32 (!%p1958_p3), 96, %s2023_s9  ;;  %s183_s22 = scalar_lea.sflag (!%p1958_p3), [#allocation3], %s2023_s9 }
  0x2c   : > { %s2027_s23 = scalar_lea.vmem (!%p1958_p3), [#allocation2], %s1659_s16 }
  0x2e   : > { %1878 = dma.done.wait (%p1987_p12), %s183_s22, 1536  }
  0x2f   : > { %1880 = vsyncadd (%p1987_p12), %s183_s22, 4294965760 }
  0x30   : > { %1882 = dma.done.wait (%p41_p1), [#allocation6], 73776  }
  0x31   : > { %1884 = vsyncadd (%p41_p1), [#allocation6], 4294893520  ;;  %v277_v0 = vld [vmem:[#allocation5 + $0x168] sm:$0xff]  ;;  %v274_v2 = vld [vmem:[#allocation5 + $0x150] sm:$0xff]  ;;  %s1660_s20 = smul.u32 24, %s2023_s9  ;;  %s1540_s29 = scalar_lea.sflag [#allocation4], %s2023_s9 }
  0x32   : > { %v373_v1 = vld [vmem:[#allocation5 + $0x468] sm:$0xff]  ;;  %816 = vmatpush.msra.mxu0 %v277_v0  ;;  %v370_v4 = vld [vmem:[#allocation5 + $0x450] sm:$0xff]  ;;  %v271_v6 = vld [vmem:[#allocation5 + $0x138] sm:$0xff]  ;;  %s1661_s18 = smul.u32 24, %s1953_s19  ;;  %s1853_s21 = scalar_lea.hbm %s2159_s3, 48 }
  0x33   : > { %856 = vmatpush.msra.mxu2 %v373_v1  ;;  %v325_v3 = vld [vmem:[#allocation5 + $0x2e8] sm:$0xff]  ;;  %v322_v7 = vld [vmem:[#allocation5 + $0x2d0] sm:$0xff]  ;;  %v367_v8 = vld [vmem:[#allocation5 + $0x438] sm:$0xff]  ;;  %s2103_s8 = scalar_lea.vmem [#allocation8], %s1660_s20 }
  0x34   : > { %v421_v5 = vld [vmem:[#allocation5 + $0x5e8] sm:$0xff]  ;;  %836 = vmatpush.msra.mxu1 %v325_v3  ;;  %817 = vmatpush.msra.mxu0 %v274_v2  ;;  %v418_v9 = vld [vmem:[#allocation5 + $0x5d0] sm:$0xff]  ;;  %v319_v10 = vld [vmem:[#allocation5 + $0x2b8] sm:$0xff]  ;;  %s1551_s26 = scalar_lea.hbm %s2159_s3, %s1661_s18  ;;  %s1553_s27 = sshll.u32 %s2103_s8, 4  ;;  %s1554_s27 = int_to_ptr.vmem [resolvable:$true] %s1553_s27 }
  0x35   : > { %876 = vmatpush.msra.mxu3 %v421_v5  ;;  %857 = vmatpush.msra.mxu2 %v370_v4  ;;  %v268_v11 = vld [vmem:[#allocation5 + $0x120] sm:$0xff]  ;;  %v415_v13 = vld [vmem:[#allocation5 + $0x5b8] sm:$0xff]  ;;  %v265_v16 = vld [vmem:[#allocation5 + $0x108] sm:$0xff]  ;;  %s1555_s28 = sshll.u32 %s1551_s26, 4  ;;  %s1556_s28 = int_to_ptr.hbm [resolvable:$true] %s1555_s28 }
  0x36   : > { %837 = vmatpush.msra.mxu1 %v322_v7  ;;  %v364_v12 = vld [vmem:[#allocation5 + $0x420] sm:$0xff]  ;;  %818 = vmatpush.msra.mxu0 %v271_v6  ;;  %v361_v17 = vld [vmem:[#allocation5 + $0x408] sm:$0xff]  ;;  %v262_v20 = vld [vmem:[#allocation5 + $0xf0] sm:$0xff]  ;;  %s1847_s19 = sshra.s32 %s1556_s28, 4  ;;  %s1848_s19 = int_to_ptr.hbm [resolvable:$true] %s1847_s19 }
  0x37   : > { %877 = vmatpush.msra.mxu3 %v418_v9  ;;  %858 = vmatpush.msra.mxu2 %v367_v8  ;;  %v316_v14 = vld [vmem:[#allocation5 + $0x2a0] sm:$0xff]  ;;  %v313_v18 = vld [vmem:[#allocation5 + $0x288] sm:$0xff]  ;;  %v358_v21 = vld [vmem:[#allocation5 + $0x3f0] sm:$0xff]  ;;  %s1849_s30 = scalar_lea.hbm %s1848_s19, 24  ;;  %p1854_p12 = scmp.lt.s32.totalorder %s1848_s19, %s2159_s3 }
  0x38   : > { %v412_v15 = vld [vmem:[#allocation5 + $0x5a0] sm:$0xff]  ;;  %838 = vmatpush.msra.mxu1 %v319_v10  ;;  %819 = vmatpush.msra.mxu0 %v268_v11  ;;  %v409_v19 = vld [vmem:[#allocation5 + $0x588] sm:$0xff]  ;;  %v310_v22 = vld [vmem:[#allocation5 + $0x270] sm:$0xff]  ;;  %p1850_p1 = scmp.ne.s32.totalorder %s1848_s19, %s1849_s30  ;;  %p1855_p7 = scmp.lt.s32.totalorder %s1853_s21, %s1849_s30 }
  0x39   : > { %878 = vmatpush.msra.mxu3 %v415_v13  ;;  %859 = vmatpush.msra.mxu2 %v364_v12  ;;  %v406_v23 = vld [vmem:[#allocation5 + $0x570] sm:$0xff]  ;;  %v259_v24 = vld [vmem:[#allocation5 + $0xd8] sm:$0xff]  ;;  %v256_v28 = vld [vmem:[#allocation5 + $0xc0] sm:$0xff] }
  0x3a   : > { %839 = vmatpush.msra.mxu1 %v316_v14  ;;  %820 = vmatpush.msra.mxu0 %v265_v16  ;;  %v355_v25 = vld [vmem:[#allocation5 + $0x3d8] sm:$0xff]  ;;  %v352_v29 = vld [vmem:[#allocation5 + $0x3c0] sm:$0xff]  ;;  %v253_v32 = vld [vmem:[#allocation5 + $0xa8] sm:$0xff]  ;;  %p1851_p3 = pnand %p1850_p1, %p1994_p4  ;;  %p1856_p8 = por %p1855_p7, %p1854_p12 }
  0x3b   : > { %879 = vmatpush.msra.mxu3 %v412_v15  ;;  %860 = vmatpush.msra.mxu2 %v361_v17  ;;  %v307_v26 = vld [vmem:[#allocation5 + $0x258] sm:$0xff]  ;;  %v304_v30 = vld [vmem:[#allocation5 + $0x240] sm:$0xff]  ;;  %v349_v33 = vld [vmem:[#allocation5 + $0x3a8] sm:$0xff] }
  0x3c   : > { %840 = vmatpush.msra.mxu1 %v313_v18  ;;  %821 = vmatpush.msra.mxu0 %v262_v20  ;;  %v403_v27 = vld [vmem:[#allocation5 + $0x558] sm:$0xff]  ;;  %v400_v31 = vld [vmem:[#allocation5 + $0x540] sm:$0xff]  ;;  %v301_v34 = vld [vmem:[#allocation5 + $0x228] sm:$0xff]  ;;  %p1852_p5 = pneg %p1851_p3 }
  0x3d   : > { %880 = vmatpush.msra.mxu3 %v409_v19  ;;  %861 = vmatpush.msra.mxu2 %v358_v21  ;;  %v397_v35 = vld [vmem:[#allocation5 + $0x528] sm:$0xff]  ;;  %v250_v36 = vld [vmem:[#allocation5 + $0x90] sm:$0xff]  ;;  %v247_v40 = vld [vmem:[#allocation5 + $0x78] sm:$0xff] }
  0x3e   : > { %841 = vmatpush.msra.mxu1 %v310_v22  ;;  %822 = vmatpush.msra.mxu0 %v259_v24  ;;  %v346_v37 = vld [vmem:[#allocation5 + $0x390] sm:$0xff]  ;;  %v343_v41 = vld [vmem:[#allocation5 + $0x378] sm:$0xff]  ;;  %v244_v44 = vld [vmem:[#allocation5 + $0x60] sm:$0xff]  ;;  %p1857_p9 = pnand %p1856_p8, %p1852_p5 }
  0x3f   : > { %881 = vmatpush.msra.mxu3 %v406_v23  ;;  %862 = vmatpush.msra.mxu2 %v355_v25  ;;  %v298_v38 = vld [vmem:[#allocation5 + $0x210] sm:$0xff]  ;;  %v295_v42 = vld [vmem:[#allocation5 + $0x1f8] sm:$0xff]  ;;  %v340_v45 = vld [vmem:[#allocation5 + $0x360] sm:$0xff] }
  0x40   : > { %842 = vmatpush.msra.mxu1 %v307_v26  ;;  %823 = vmatpush.msra.mxu0 %v256_v28  ;;  %v394_v39 = vld [vmem:[#allocation5 + $0x510] sm:$0xff]  ;;  %v391_v43 = vld [vmem:[#allocation5 + $0x4f8] sm:$0xff]  ;;  %v292_v46 = vld [vmem:[#allocation5 + $0x1e0] sm:$0xff] }
  0x41   : > { %882 = vmatpush.msra.mxu3 %v403_v27  ;;  %863 = vmatpush.msra.mxu2 %v352_v29  ;;  %v388_v47 = vld [vmem:[#allocation5 + $0x4e0] sm:$0xff]  ;;  %v241_v48 = vld [vmem:[#allocation5 + $0x48] sm:$0xff]  ;;  %v238_v52 = vld [vmem:[#allocation5 + $0x30] sm:$0xff] }
  0x42   : > { %843 = vmatpush.msra.mxu1 %v304_v30  ;;  %824 = vmatpush.msra.mxu0 %v253_v32  ;;  %v337_v49 = vld [vmem:[#allocation5 + $0x348] sm:$0xff]  ;;  %v334_v53 = vld [vmem:[#allocation5 + $0x330] sm:$0xff]  ;;  %v235_v56 = vld [vmem:[#allocation5 + $0x18] sm:$0xff] }
  0x43   : > { %883 = vmatpush.msra.mxu3 %v400_v31  ;;  %864 = vmatpush.msra.mxu2 %v349_v33  ;;  %v289_v50 = vld [vmem:[#allocation5 + $0x1c8] sm:$0xff]  ;;  %v286_v54 = vld [vmem:[#allocation5 + $0x1b0] sm:$0xff]  ;;  %v331_v57 = vld [vmem:[#allocation5 + $0x318] sm:$0xff] }
  0x44   : > { %844 = vmatpush.msra.mxu1 %v301_v34  ;;  %825 = vmatpush.msra.mxu0 %v250_v36  ;;  %v385_v51 = vld [vmem:[#allocation5 + $0x4c8] sm:$0xff]  ;;  %v382_v55 = vld [vmem:[#allocation5 + $0x4b0] sm:$0xff]  ;;  %v283_v58 = vld [vmem:[#allocation5 + $0x198] sm:$0xff] }
  0x45   : > { %884 = vmatpush.msra.mxu3 %v397_v35  ;;  %865 = vmatpush.msra.mxu2 %v346_v37  ;;  %v379_v59 = vld [vmem:[#allocation5 + $0x498] sm:$0xff]  ;;  %v232_v60 = vld [vmem:[#allocation5] sm:$0xff]  ;;  %v469_v62 = vld [vmem:[#allocation5 + $0x768] sm:$0xff] }
  0x46   : > { %845 = vmatpush.msra.mxu1 %v298_v38  ;;  %826 = vmatpush.msra.mxu0 %v247_v40  ;;  %v328_v61 = vld [vmem:[#allocation5 + $0x300] sm:$0xff]  ;;  %v565_v63 = vld [vmem:[#allocation5 + $0xa68] sm:$0xff]  ;;  %v466_v2 = vld [vmem:[#allocation5 + $0x750] sm:$0xff] }
  0x47   : > { %885 = vmatpush.msra.mxu3 %v394_v39  ;;  %866 = vmatpush.msra.mxu2 %v343_v41  ;;  %v280_v0 = vld [vmem:[#allocation5 + $0x180] sm:$0xff]  ;;  %v517_v3 = vld [vmem:[#allocation5 + $0x8e8] sm:$0xff]  ;;  %v562_v4 = vld [vmem:[#allocation5 + $0xa50] sm:$0xff] }
  0x48   : > { %846 = vmatpush.msra.mxu1 %v295_v42  ;;  %827 = vmatpush.msra.mxu0 %v244_v44  ;;  %v376_v1 = vld [vmem:[#allocation5 + $0x480] sm:$0xff]  ;;  %v613_v5 = vld [vmem:[#allocation5 + $0xbe8] sm:$0xff]  ;;  %v463_v6 = vld [vmem:[#allocation5 + $0x738] sm:$0xff] }
  0x49   : > { %886 = vmatpush.msra.mxu3 %v391_v43  ;;  %867 = vmatpush.msra.mxu2 %v340_v45  ;;  %v514_v7 = vld [vmem:[#allocation5 + $0x8d0] sm:$0xff]  ;;  %v559_v8 = vld [vmem:[#allocation5 + $0xa38] sm:$0xff]  ;;  %v460_v10 = vld [vmem:[#allocation5 + $0x720] sm:$0xff] }
  0x4a   : > { %847 = vmatpush.msra.mxu1 %v292_v46  ;;  %828 = vmatpush.msra.mxu0 %v241_v48  ;;  %v610_v9 = vld [vmem:[#allocation5 + $0xbd0] sm:$0xff]  ;;  %v511_v11 = vld [vmem:[#allocation5 + $0x8b8] sm:$0xff]  ;;  %v556_v12 = vld [vmem:[#allocation5 + $0xa20] sm:$0xff] }
  0x4b   : > { %887 = vmatpush.msra.mxu3 %v388_v47  ;;  %868 = vmatpush.msra.mxu2 %v337_v49  ;;  %v607_v13 = vld [vmem:[#allocation5 + $0xbb8] sm:$0xff]  ;;  %v457_v14 = vld [vmem:[#allocation5 + $0x708] sm:$0xff]  ;;  %v508_v15 = vld [vmem:[#allocation5 + $0x8a0] sm:$0xff] }
  0x4c   : > { %848 = vmatpush.msra.mxu1 %v289_v50  ;;  %829 = vmatpush.msra.mxu0 %v238_v52  ;;  %v553_v16 = vld [vmem:[#allocation5 + $0xa08] sm:$0xff]  ;;  %v604_v17 = vld [vmem:[#allocation5 + $0xba0] sm:$0xff]  ;;  %v454_v18 = vld [vmem:[#allocation5 + $0x6f0] sm:$0xff] }
  0x4d   : > { %888 = vmatpush.msra.mxu3 %v385_v51  ;;  %869 = vmatpush.msra.mxu2 %v334_v53  ;;  %v505_v19 = vld [vmem:[#allocation5 + $0x888] sm:$0xff]  ;;  %v550_v20 = vld [vmem:[#allocation5 + $0x9f0] sm:$0xff]  ;;  %v451_v22 = vld [vmem:[#allocation5 + $0x6d8] sm:$0xff] }
  0x4e   : > { %849 = vmatpush.msra.mxu1 %v286_v54  ;;  %830 = vmatpush.msra.mxu0 %v235_v56  ;;  %v601_v21 = vld [vmem:[#allocation5 + $0xb88] sm:$0xff]  ;;  %v502_v23 = vld [vmem:[#allocation5 + $0x870] sm:$0xff]  ;;  %v547_v24 = vld [vmem:[#allocation5 + $0x9d8] sm:$0xff] }
  0x4f   : > { %889 = vmatpush.msra.mxu3 %v382_v55  ;;  %870 = vmatpush.msra.mxu2 %v331_v57  ;;  %v598_v25 = vld [vmem:[#allocation5 + $0xb70] sm:$0xff]  ;;  %v448_v26 = vld [vmem:[#allocation5 + $0x6c0] sm:$0xff]  ;;  %v499_v27 = vld [vmem:[#allocation5 + $0x858] sm:$0xff] }
  0x50   : > { %850 = vmatpush.msra.mxu1 %v283_v58  ;;  %831 = vmatpush.msra.mxu0 %v232_v60  ;;  %v544_v28 = vld [vmem:[#allocation5 + $0x9c0] sm:$0xff]  ;;  %v595_v29 = vld [vmem:[#allocation5 + $0xb58] sm:$0xff]  ;;  %v445_v30 = vld [vmem:[#allocation5 + $0x6a8] sm:$0xff] }
  0x51   : > { %890 = vmatpush.msra.mxu3 %v379_v59  ;;  %871 = vmatpush.msra.mxu2 %v328_v61  ;;  %v496_v31 = vld [vmem:[#allocation5 + $0x840] sm:$0xff]  ;;  %v541_v32 = vld [vmem:[#allocation5 + $0x9a8] sm:$0xff]  ;;  %v442_v34 = vld [vmem:[#allocation5 + $0x690] sm:$0xff] }
  0x52   : > { %896 = vmatpush.msrb.mxu0 %v469_v62  ;;  %851 = vmatpush.msra.mxu1 %v280_v0  ;;  %v592_v33 = vld [vmem:[#allocation5 + $0xb40] sm:$0xff]  ;;  %v493_v35 = vld [vmem:[#allocation5 + $0x828] sm:$0xff]  ;;  %v538_v36 = vld [vmem:[#allocation5 + $0x990] sm:$0xff] }
  0x53   : > { %936 = vmatpush.msrb.mxu2 %v565_v63  ;;  %891 = vmatpush.msra.mxu3 %v376_v1  ;;  %v589_v37 = vld [vmem:[#allocation5 + $0xb28] sm:$0xff]  ;;  %v439_v38 = vld [vmem:[#allocation5 + $0x678] sm:$0xff]  ;;  %v490_v39 = vld [vmem:[#allocation5 + $0x810] sm:$0xff] }
  0x54   : > { %897 = vmatpush.msrb.mxu0 %v466_v2  ;;  %916 = vmatpush.msrb.mxu1 %v517_v3  ;;  %v535_v40 = vld [vmem:[#allocation5 + $0x978] sm:$0xff]  ;;  %v586_v41 = vld [vmem:[#allocation5 + $0xb10] sm:$0xff]  ;;  %v436_v42 = vld [vmem:[#allocation5 + $0x660] sm:$0xff] }
  0x55   : > { %937 = vmatpush.msrb.mxu2 %v562_v4  ;;  %956 = vmatpush.msrb.mxu3 %v613_v5  ;;  %v487_v43 = vld [vmem:[#allocation5 + $0x7f8] sm:$0xff]  ;;  %v532_v44 = vld [vmem:[#allocation5 + $0x960] sm:$0xff]  ;;  %v433_v46 = vld [vmem:[#allocation5 + $0x648] sm:$0xff] }
  0x56   : > { %898 = vmatpush.msrb.mxu0 %v463_v6  ;;  %917 = vmatpush.msrb.mxu1 %v514_v7  ;;  %v583_v45 = vld [vmem:[#allocation5 + $0xaf8] sm:$0xff]  ;;  %v484_v47 = vld [vmem:[#allocation5 + $0x7e0] sm:$0xff]  ;;  %v529_v48 = vld [vmem:[#allocation5 + $0x948] sm:$0xff] }
  0x57   : > { %938 = vmatpush.msrb.mxu2 %v559_v8  ;;  %957 = vmatpush.msrb.mxu3 %v610_v9  ;;  %v580_v49 = vld [vmem:[#allocation5 + $0xae0] sm:$0xff]  ;;  %v430_v50 = vld [vmem:[#allocation5 + $0x630] sm:$0xff]  ;;  %v481_v51 = vld [vmem:[#allocation5 + $0x7c8] sm:$0xff] }
  0x58   : > { %899 = vmatpush.msrb.mxu0 %v460_v10  ;;  %918 = vmatpush.msrb.mxu1 %v511_v11  ;;  %v526_v52 = vld [vmem:[#allocation5 + $0x930] sm:$0xff]  ;;  %v577_v53 = vld [vmem:[#allocation5 + $0xac8] sm:$0xff]  ;;  %v427_v54 = vld [vmem:[#allocation5 + $0x618] sm:$0xff] }
  0x59   : > { %939 = vmatpush.msrb.mxu2 %v556_v12  ;;  %958 = vmatpush.msrb.mxu3 %v607_v13  ;;  %v478_v55 = vld [vmem:[#allocation5 + $0x7b0] sm:$0xff]  ;;  %v523_v56 = vld [vmem:[#allocation5 + $0x918] sm:$0xff]  ;;  %v424_v58 = vld [vmem:[#allocation5 + $0x600] sm:$0xff] }
  0x5a   : > { %900 = vmatpush.msrb.mxu0 %v457_v14  ;;  %919 = vmatpush.msrb.mxu1 %v508_v15  ;;  %v574_v57 = vld [vmem:[#allocation5 + $0xab0] sm:$0xff]  ;;  %v475_v59 = vld [vmem:[#allocation5 + $0x798] sm:$0xff]  ;;  %v520_v60 = vld [vmem:[#allocation5 + $0x900] sm:$0xff] }
  0x5b   : > { %940 = vmatpush.msrb.mxu2 %v553_v16  ;;  %959 = vmatpush.msrb.mxu3 %v604_v17  ;;  %v571_v61 = vld [vmem:[#allocation5 + $0xa98] sm:$0xff]  ;;  %v2038_v62 = vld [vmem:[%s2027_s23] sm:$0xff]  ;;  %v2041_v63 = vld [vmem:[%s2027_s23 + $0x10] sm:$0xff] }
  0x5c   : > { %901 = vmatpush.msrb.mxu0 %v454_v18  ;;  %920 = vmatpush.msrb.mxu1 %v505_v19  ;;  %v661_v0 = vld [vmem:[#allocation5 + $0xd68] sm:$0xff]  ;;  %v472_v2 = vld [vmem:[#allocation5 + $0x780] sm:$0xff]  ;;  %v2049_v5 = vld [vmem:[%s2027_s23 + $0x18] sm:$0xff] }
  0x5d   : > { %941 = vmatpush.msrb.mxu2 %v550_v20  ;;  %960 = vmatpush.msrb.mxu3 %v601_v21  ;;  %v757_v1 = vld [vmem:[#allocation5 + $0x1068] sm:$0xff]  ;;  %v568_v3 = vld [vmem:[#allocation5 + $0xa80] sm:$0xff]  ;;  %v658_v6 = vld [vmem:[#allocation5 + $0xd50] sm:$0xff] }
  0x5e   : > { %902 = vmatpush.msrb.mxu0 %v451_v22  ;;  %921 = vmatpush.msrb.mxu1 %v502_v23  ;;  %v2046_v4 = vld [vmem:[%s2027_s23 + $0x8] sm:$0xff]  ;;  %v754_v8 = vld [vmem:[#allocation5 + $0x1050] sm:$0xff]  ;;  %v655_v10 = vld [vmem:[#allocation5 + $0xd38] sm:$0xff] }
  0x5f   : > { %942 = vmatpush.msrb.mxu2 %v547_v24  ;;  %961 = vmatpush.msrb.mxu3 %v598_v25  ;;  %v709_v7 = vld [vmem:[#allocation5 + $0xee8] sm:$0xff]  ;;  %v706_v11 = vld [vmem:[#allocation5 + $0xed0] sm:$0xff]  ;;  %v751_v12 = vld [vmem:[#allocation5 + $0x1038] sm:$0xff] }
  0x60   : > { %903 = vmatpush.msrb.mxu0 %v448_v26  ;;  %922 = vmatpush.msrb.mxu1 %v499_v27  ;;  %v805_v9 = vld [vmem:[#allocation5 + $0x11e8] sm:$0xff]  ;;  %v802_v13 = vld [vmem:[#allocation5 + $0x11d0] sm:$0xff]  ;;  %v652_v14 = vld [vmem:[#allocation5 + $0xd20] sm:$0xff] }
  0x61   : > { %943 = vmatpush.msrb.mxu2 %v544_v28  ;;  %962 = vmatpush.msrb.mxu3 %v595_v29  ;;  %v703_v15 = vld [vmem:[#allocation5 + $0xeb8] sm:$0xff]  ;;  %v748_v16 = vld [vmem:[#allocation5 + $0x1020] sm:$0xff]  ;;  %v2054_v18 = vld [vmem:[%s2027_s23 + $0x30] sm:$0xff] }
  0x62   : > { %904 = vmatpush.msrb.mxu0 %v445_v30  ;;  %923 = vmatpush.msrb.mxu1 %v496_v31  ;;  %v799_v17 = vld [vmem:[#allocation5 + $0x11b8] sm:$0xff]  ;;  %v649_v19 = vld [vmem:[#allocation5 + $0xd08] sm:$0xff]  ;;  %v700_v20 = vld [vmem:[#allocation5 + $0xea0] sm:$0xff] }
  0x63   : > { %944 = vmatpush.msrb.mxu2 %v541_v32  ;;  %963 = vmatpush.msrb.mxu3 %v592_v33  ;;  %v745_v21 = vld [vmem:[#allocation5 + $0x1008] sm:$0xff]  ;;  %v796_v22 = vld [vmem:[#allocation5 + $0x11a0] sm:$0xff]  ;;  %v2061_v24 = vld [vmem:[%s2027_s23 + $0x38] sm:$0xff] }
  0x64   : > { %905 = vmatpush.msrb.mxu0 %v442_v34  ;;  %924 = vmatpush.msrb.mxu1 %v493_v35  ;;  %v2057_v23 = vld [vmem:[%s2027_s23 + $0x20] sm:$0xff]  ;;  %v646_v25 = vld [vmem:[#allocation5 + $0xcf0] sm:$0xff]  ;;  %v697_v26 = vld [vmem:[#allocation5 + $0xe88] sm:$0xff] }
  0x65   : > { %945 = vmatpush.msrb.mxu2 %v538_v36  ;;  %964 = vmatpush.msrb.mxu3 %v589_v37  ;;  %v742_v27 = vld [vmem:[#allocation5 + $0xff0] sm:$0xff]  ;;  %v793_v28 = vld [vmem:[#allocation5 + $0x1188] sm:$0xff]  ;;  %v643_v30 = vld [vmem:[#allocation5 + $0xcd8] sm:$0xff] }
  0x66   : > { %906 = vmatpush.msrb.mxu0 %v439_v38  ;;  %925 = vmatpush.msrb.mxu1 %v490_v39  ;;  %v2065_v29 = vld [vmem:[%s2027_s23 + $0x28] sm:$0xff]  ;;  %v694_v31 = vld [vmem:[#allocation5 + $0xe70] sm:$0xff]  ;;  %v739_v32 = vld [vmem:[#allocation5 + $0xfd8] sm:$0xff] }
  0x67   : > { %946 = vmatpush.msrb.mxu2 %v535_v40  ;;  %965 = vmatpush.msrb.mxu3 %v586_v41  ;;  %v790_v33 = vld [vmem:[#allocation5 + $0x1170] sm:$0xff]  ;;  %v640_v34 = vld [vmem:[#allocation5 + $0xcc0] sm:$0xff]  ;;  %v691_v35 = vld [vmem:[#allocation5 + $0xe58] sm:$0xff] }
  0x68   : > { %907 = vmatpush.msrb.mxu0 %v436_v42  ;;  %926 = vmatpush.msrb.mxu1 %v487_v43  ;;  %v736_v36 = vld [vmem:[#allocation5 + $0xfc0] sm:$0xff]  ;;  %v787_v37 = vld [vmem:[#allocation5 + $0x1158] sm:$0xff]  ;;  %v637_v38 = vld [vmem:[#allocation5 + $0xca8] sm:$0xff] }
  0x69   : > { %947 = vmatpush.msrb.mxu2 %v532_v44  ;;  %966 = vmatpush.msrb.mxu3 %v583_v45  ;;  %v688_v39 = vld [vmem:[#allocation5 + $0xe40] sm:$0xff]  ;;  %v733_v40 = vld [vmem:[#allocation5 + $0xfa8] sm:$0xff]  ;;  %v634_v42 = vld [vmem:[#allocation5 + $0xc90] sm:$0xff] }
  0x6a   : > { %908 = vmatpush.msrb.mxu0 %v433_v46  ;;  %927 = vmatpush.msrb.mxu1 %v484_v47  ;;  %v784_v41 = vld [vmem:[#allocation5 + $0x1140] sm:$0xff]  ;;  %v685_v43 = vld [vmem:[#allocation5 + $0xe28] sm:$0xff]  ;;  %v730_v44 = vld [vmem:[#allocation5 + $0xf90] sm:$0xff] }
  0x6b   : > { %948 = vmatpush.msrb.mxu2 %v529_v48  ;;  %967 = vmatpush.msrb.mxu3 %v580_v49  ;;  %v781_v45 = vld [vmem:[#allocation5 + $0x1128] sm:$0xff]  ;;  %v631_v46 = vld [vmem:[#allocation5 + $0xc78] sm:$0xff]  ;;  %v682_v47 = vld [vmem:[#allocation5 + $0xe10] sm:$0xff] }
  0x6c   : > { %909 = vmatpush.msrb.mxu0 %v430_v50  ;;  %928 = vmatpush.msrb.mxu1 %v481_v51  ;;  %v727_v48 = vld [vmem:[#allocation5 + $0xf78] sm:$0xff]  ;;  %v778_v49 = vld [vmem:[#allocation5 + $0x1110] sm:$0xff]  ;;  %v628_v50 = vld [vmem:[#allocation5 + $0xc60] sm:$0xff] }
  0x6d   : > { %949 = vmatpush.msrb.mxu2 %v526_v52  ;;  %968 = vmatpush.msrb.mxu3 %v577_v53  ;;  %v679_v51 = vld [vmem:[#allocation5 + $0xdf8] sm:$0xff]  ;;  %v724_v52 = vld [vmem:[#allocation5 + $0xf60] sm:$0xff] }
  0x6e   : > { %910 = vmatpush.msrb.mxu0 %v427_v54  ;;  %929 = vmatpush.msrb.mxu1 %v478_v55  ;;  %v775_v53 = vld [vmem:[#allocation5 + $0x10f8] sm:$0xff]  ;;  %v625_v54 = vld [vmem:[#allocation5 + $0xc48] sm:$0xff]  ;;  %v676_v55 = vld [vmem:[#allocation5 + $0xde0] sm:$0xff] }
  0x6f   : > { %950 = vmatpush.msrb.mxu2 %v523_v56  ;;  %969 = vmatpush.msrb.mxu3 %v574_v57  ;;  %v721_v56 = vld [vmem:[#allocation5 + $0xf48] sm:$0xff]  ;;  %v772_v57 = vld [vmem:[#allocation5 + $0x10e0] sm:$0xff] }
  0x70   : > { %911 = vmatpush.msrb.mxu0 %v424_v58  ;;  %930 = vmatpush.msrb.mxu1 %v475_v59  ;;  %v622_v58 = vld [vmem:[#allocation5 + $0xc30] sm:$0xff]  ;;  %v673_v59 = vld [vmem:[#allocation5 + $0xdc8] sm:$0xff] }
  0x71   : > { %951 = vmatpush.msrb.mxu2 %v520_v60  ;;  %970 = vmatpush.msrb.mxu3 %v571_v61  ;;  %v718_v60 = vld [vmem:[#allocation5 + $0xf30] sm:$0xff]  ;;  %v769_v61 = vld [vmem:[#allocation5 + $0x10c8] sm:$0xff] }
  0x72   : > { %832 = vmatmul.f32.vlgmr.msra.gmra.mxu0 %v2038_v62  ;;  %872 = vmatmul.f32.vlgmr.msra.gmra.mxu2 %v2041_v63 }
  0x73   : > { %976 = vmatpush.msra.mxu0 %v661_v0  ;;  %1016 = vmatpush.msra.mxu2 %v757_v1  ;;  %v619_v0 = vld [vmem:[#allocation5 + $0xc18] sm:$0xff]  ;;  %v670_v1 = vld [vmem:[#allocation5 + $0xdb0] sm:$0xff] }
  0x74   : > { %931 = vmatpush.msrb.mxu1 %v472_v2  ;;  %971 = vmatpush.msrb.mxu3 %v568_v3  ;;  %v715_v2 = vld [vmem:[#allocation5 + $0xf18] sm:$0xff]  ;;  %v766_v3 = vld [vmem:[#allocation5 + $0x10b0] sm:$0xff] }
  0x75   : > { %852 = vmatmul.f32.vlgmr.msra.gmra.mxu1 %v2046_v4  ;;  %892 = vmatmul.f32.vlgmr.msra.gmra.mxu3 %v2049_v5 }
  0x76   : > { %977 = vmatpush.msra.mxu0 %v658_v6  ;;  %996 = vmatpush.msra.mxu1 %v709_v7  ;;  %v616_v6 = vld [vmem:[#allocation5 + $0xc00] sm:$0xff]  ;;  %v667_v7 = vld [vmem:[#allocation5 + $0xd98] sm:$0xff] }
  0x77   : > { %1017 = vmatpush.msra.mxu2 %v754_v8  ;;  %1036 = vmatpush.msra.mxu3 %v805_v9  ;;  %v712_v8 = vld [vmem:[#allocation5 + $0xf00] sm:$0xff]  ;;  %v763_v9 = vld [vmem:[#allocation5 + $0x1098] sm:$0xff] }
  0x78   : > { %978 = vmatpush.msra.mxu0 %v655_v10  ;;  %997 = vmatpush.msra.mxu1 %v706_v11  ;;  %v2070_v10 = vld [vmem:[%s2027_s23 + $0x40] sm:$0xff]  ;;  %v2073_v11 = vld [vmem:[%s2027_s23 + $0x50] sm:$0xff] }
  0x79   : > { %1018 = vmatpush.msra.mxu2 %v751_v12  ;;  %1037 = vmatpush.msra.mxu3 %v802_v13  ;;  %v278_v12 = vld [vmem:[#allocation5 + $0x170] sm:$0xff] }
  0x7a   : > { %979 = vmatpush.msra.mxu0 %v652_v14  ;;  %998 = vmatpush.msra.mxu1 %v703_v15  ;;  %v374_v13 = vld [vmem:[#allocation5 + $0x470] sm:$0xff]  ;;  %v664_v14 = vld [vmem:[#allocation5 + $0xd80] sm:$0xff] }
  0x7b   : > { %1019 = vmatpush.msra.mxu2 %v748_v16  ;;  %1038 = vmatpush.msra.mxu3 %v799_v17  ;;  %v760_v15 = vld [vmem:[#allocation5 + $0x1080] sm:$0xff]  ;;  %v2078_v16 = vld [vmem:[%s2027_s23 + $0x48] sm:$0xff]  ;;  %v2081_v17 = vld [vmem:[%s2027_s23 + $0x58] sm:$0xff] }
  0x7c   : > { %952 = vmatmul.f32.vlgmr.msrb.gmra.mxu2 %v2054_v18  ;;  %980 = vmatpush.msra.mxu0 %v649_v19  ;;  %v275_v19 = vld [vmem:[#allocation5 + $0x158] sm:$0xff] }
  0x7d   : > { %999 = vmatpush.msra.mxu1 %v700_v20  ;;  %1020 = vmatpush.msra.mxu2 %v745_v21  ;;  %v326_v20 = vld [vmem:[#allocation5 + $0x2f0] sm:$0xff]  ;;  %v371_v21 = vld [vmem:[#allocation5 + $0x458] sm:$0xff] }
  0x7e   : > { %1039 = vmatpush.msra.mxu3 %v796_v22  ;;  %912 = vmatmul.f32.vlgmr.msrb.gmra.mxu0 %v2057_v23  ;;  %v422_v22 = vld [vmem:[#allocation5 + $0x5f0] sm:$0xff] }
  0x7f   : > { %972 = vmatmul.f32.vlgmr.msrb.gmra.mxu3 %v2061_v24  ;;  %981 = vmatpush.msra.mxu0 %v646_v25  ;;  %v272_v25 = vld [vmem:[#allocation5 + $0x140] sm:$0xff] }
  0x80   : > { %1000 = vmatpush.msra.mxu1 %v697_v26  ;;  %1021 = vmatpush.msra.mxu2 %v742_v27  ;;  %v323_v26 = vld [vmem:[#allocation5 + $0x2d8] sm:$0xff]  ;;  %v368_v27 = vld [vmem:[#allocation5 + $0x440] sm:$0xff] }
  0x81   : > { %1040 = vmatpush.msra.mxu3 %v793_v28  ;;  %932 = vmatmul.f32.vlgmr.msrb.gmra.mxu1 %v2065_v29  ;;  %v419_v28 = vld [vmem:[#allocation5 + $0x5d8] sm:$0xff] }
  0x82   : > { %982 = vmatpush.msra.mxu0 %v643_v30  ;;  %1001 = vmatpush.msra.mxu1 %v694_v31  ;;  %v269_v30 = vld [vmem:[#allocation5 + $0x128] sm:$0xff]  ;;  %v320_v31 = vld [vmem:[#allocation5 + $0x2c0] sm:$0xff] }
  0x83   : > { %1022 = vmatpush.msra.mxu2 %v739_v32  ;;  %1041 = vmatpush.msra.mxu3 %v790_v33  ;;  %v365_v32 = vld [vmem:[#allocation5 + $0x428] sm:$0xff]  ;;  %v416_v33 = vld [vmem:[#allocation5 + $0x5c0] sm:$0xff] }
  0x84   : > { %983 = vmatpush.msra.mxu0 %v640_v34  ;;  %1002 = vmatpush.msra.mxu1 %v691_v35  ;;  %v266_v34 = vld [vmem:[#allocation5 + $0x110] sm:$0xff]  ;;  %v317_v35 = vld [vmem:[#allocation5 + $0x2a8] sm:$0xff] }
  0x85   : > { %1023 = vmatpush.msra.mxu2 %v736_v36  ;;  %1042 = vmatpush.msra.mxu3 %v787_v37  ;;  %v362_v36 = vld [vmem:[#allocation5 + $0x410] sm:$0xff]  ;;  %v413_v37 = vld [vmem:[#allocation5 + $0x5a8] sm:$0xff] }
  0x86   : > { %984 = vmatpush.msra.mxu0 %v637_v38  ;;  %1003 = vmatpush.msra.mxu1 %v688_v39  ;;  %v263_v38 = vld [vmem:[#allocation5 + $0xf8] sm:$0xff]  ;;  %v314_v39 = vld [vmem:[#allocation5 + $0x290] sm:$0xff] }
  0x87   : > { %1024 = vmatpush.msra.mxu2 %v733_v40  ;;  %1043 = vmatpush.msra.mxu3 %v784_v41  ;;  %v359_v40 = vld [vmem:[#allocation5 + $0x3f8] sm:$0xff]  ;;  %v410_v41 = vld [vmem:[#allocation5 + $0x590] sm:$0xff] }
  0x88   : > { %985 = vmatpush.msra.mxu0 %v634_v42  ;;  %1004 = vmatpush.msra.mxu1 %v685_v43  ;;  %v260_v42 = vld [vmem:[#allocation5 + $0xe0] sm:$0xff]  ;;  %v311_v43 = vld [vmem:[#allocation5 + $0x278] sm:$0xff] }
  0x89   : > { %1025 = vmatpush.msra.mxu2 %v730_v44  ;;  %1044 = vmatpush.msra.mxu3 %v781_v45  ;;  %v356_v44 = vld [vmem:[#allocation5 + $0x3e0] sm:$0xff]  ;;  %v407_v45 = vld [vmem:[#allocation5 + $0x578] sm:$0xff] }
  0x8a   : > { %986 = vmatpush.msra.mxu0 %v631_v46  ;;  %1005 = vmatpush.msra.mxu1 %v682_v47  ;;  %v257_v46 = vld [vmem:[#allocation5 + $0xc8] sm:$0xff]  ;;  %v308_v47 = vld [vmem:[#allocation5 + $0x260] sm:$0xff] }
  0x8b   : > { %1026 = vmatpush.msra.mxu2 %v727_v48  ;;  %1045 = vmatpush.msra.mxu3 %v778_v49  ;;  %v353_v48 = vld [vmem:[#allocation5 + $0x3c8] sm:$0xff]  ;;  %v404_v49 = vld [vmem:[#allocation5 + $0x560] sm:$0xff] }
  0x8c   : > { %987 = vmatpush.msra.mxu0 %v628_v50  ;;  %1006 = vmatpush.msra.mxu1 %v679_v51  ;;  %v254_v50 = vld [vmem:[#allocation5 + $0xb0] sm:$0xff]  ;;  %v305_v51 = vld [vmem:[#allocation5 + $0x248] sm:$0xff] }
  0x8d   : > { %1027 = vmatpush.msra.mxu2 %v724_v52  ;;  %1046 = vmatpush.msra.mxu3 %v775_v53  ;;  %v350_v52 = vld [vmem:[#allocation5 + $0x3b0] sm:$0xff]  ;;  %v401_v53 = vld [vmem:[#allocation5 + $0x548] sm:$0xff] }
  0x8e   : > { %988 = vmatpush.msra.mxu0 %v625_v54  ;;  %1007 = vmatpush.msra.mxu1 %v676_v55  ;;  %v251_v54 = vld [vmem:[#allocation5 + $0x98] sm:$0xff]  ;;  %v302_v55 = vld [vmem:[#allocation5 + $0x230] sm:$0xff] }
  0x8f   : > { %1028 = vmatpush.msra.mxu2 %v721_v56  ;;  %1047 = vmatpush.msra.mxu3 %v772_v57  ;;  %v347_v56 = vld [vmem:[#allocation5 + $0x398] sm:$0xff]  ;;  %v398_v57 = vld [vmem:[#allocation5 + $0x530] sm:$0xff] }
  0x90   : > { %989 = vmatpush.msra.mxu0 %v622_v58  ;;  %1008 = vmatpush.msra.mxu1 %v673_v59  ;;  %v248_v58 = vld [vmem:[#allocation5 + $0x80] sm:$0xff]  ;;  %v299_v59 = vld [vmem:[#allocation5 + $0x218] sm:$0xff] }
  0x91   : > { %1029 = vmatpush.msra.mxu2 %v718_v60  ;;  %1048 = vmatpush.msra.mxu3 %v769_v61  ;;  %v344_v60 = vld [vmem:[#allocation5 + $0x380] sm:$0xff]  ;;  %v395_v61 = vld [vmem:[#allocation5 + $0x518] sm:$0xff] }
  0x92   : > { %990 = vmatpush.msra.mxu0 %v619_v0  ;;  %1009 = vmatpush.msra.mxu1 %v670_v1  ;;  %v245_v0 = vld [vmem:[#allocation5 + $0x68] sm:$0xff]  ;;  %v296_v1 = vld [vmem:[#allocation5 + $0x200] sm:$0xff] }
  0x93   : > { %1030 = vmatpush.msra.mxu2 %v715_v2  ;;  %1049 = vmatpush.msra.mxu3 %v766_v3  ;;  %v341_v2 = vld [vmem:[#allocation5 + $0x368] sm:$0xff]  ;;  %v392_v3 = vld [vmem:[#allocation5 + $0x500] sm:$0xff] }
  0x94   : > { %991 = vmatpush.msra.mxu0 %v616_v6  ;;  %1010 = vmatpush.msra.mxu1 %v667_v7  ;;  %v242_v6 = vld [vmem:[#allocation5 + $0x50] sm:$0xff]  ;;  %v293_v7 = vld [vmem:[#allocation5 + $0x1e8] sm:$0xff] }
  0x95   : > { %1031 = vmatpush.msra.mxu2 %v712_v8  ;;  %1050 = vmatpush.msra.mxu3 %v763_v9  ;;  %v338_v8 = vld [vmem:[#allocation5 + $0x350] sm:$0xff]  ;;  %v389_v9 = vld [vmem:[#allocation5 + $0x4e8] sm:$0xff] }
  0x96   : > { %992 = vmatmul.f32.vlgmr.msra.gmra.mxu0 %v2070_v10  ;;  %1032 = vmatmul.f32.vlgmr.msra.gmra.mxu2 %v2073_v11 }
  0x97   : > { %1056 = vmatpush.msrb.mxu0 %v278_v12  ;;  %1096 = vmatpush.msrb.mxu2 %v374_v13  ;;  %v239_v12 = vld [vmem:[#allocation5 + $0x38] sm:$0xff]  ;;  %v290_v13 = vld [vmem:[#allocation5 + $0x1d0] sm:$0xff] }
  0x98   : > { %1011 = vmatpush.msra.mxu1 %v664_v14  ;;  %1051 = vmatpush.msra.mxu3 %v760_v15  ;;  %v335_v14 = vld [vmem:[#allocation5 + $0x338] sm:$0xff]  ;;  %v386_v15 = vld [vmem:[#allocation5 + $0x4d0] sm:$0xff] }
  0x99   : > { %1012 = vmatmul.f32.vlgmr.msra.gmra.mxu1 %v2078_v16  ;;  %1052 = vmatmul.f32.vlgmr.msra.gmra.mxu3 %v2081_v17 }
  0x9a   : > { %1057 = vmatpush.msrb.mxu0 %v275_v19  ;;  %1076 = vmatpush.msrb.mxu1 %v326_v20  ;;  %v236_v19 = vld [vmem:[#allocation5 + $0x20] sm:$0xff]  ;;  %v287_v20 = vld [vmem:[#allocation5 + $0x1b8] sm:$0xff] }
  0x9b   : > { %1097 = vmatpush.msrb.mxu2 %v371_v21  ;;  %1116 = vmatpush.msrb.mxu3 %v422_v22  ;;  %v332_v21 = vld [vmem:[#allocation5 + $0x320] sm:$0xff]  ;;  %v383_v22 = vld [vmem:[#allocation5 + $0x4b8] sm:$0xff] }
  0x9c   : > { %1058 = vmatpush.msrb.mxu0 %v272_v25  ;;  %1077 = vmatpush.msrb.mxu1 %v323_v26  ;;  %v233_v25 = vld [vmem:[#allocation5 + $0x8] sm:$0xff]  ;;  %v284_v26 = vld [vmem:[#allocation5 + $0x1a0] sm:$0xff] }
  0x9d   : > { %1098 = vmatpush.msrb.mxu2 %v368_v27  ;;  %1117 = vmatpush.msrb.mxu3 %v419_v28  ;;  %v329_v27 = vld [vmem:[#allocation5 + $0x308] sm:$0xff]  ;;  %v380_v28 = vld [vmem:[#allocation5 + $0x4a0] sm:$0xff] }
  0x9e   : > { %1059 = vmatpush.msrb.mxu0 %v269_v30  ;;  %1078 = vmatpush.msrb.mxu1 %v320_v31  ;;  %v470_v30 = vld [vmem:[#allocation5 + $0x770] sm:$0xff] }
  0x9f   : > { %1099 = vmatpush.msrb.mxu2 %v365_v32  ;;  %1118 = vmatpush.msrb.mxu3 %v416_v33  ;;  %v566_v31 = vld [vmem:[#allocation5 + $0xa70] sm:$0xff]  ;;  %v281_v32 = vld [vmem:[#allocation5 + $0x188] sm:$0xff] }
  0xa0   : > { %1060 = vmatpush.msrb.mxu0 %v266_v34  ;;  %1079 = vmatpush.msrb.mxu1 %v317_v35  ;;  %v377_v33 = vld [vmem:[#allocation5 + $0x488] sm:$0xff]  ;;  %v467_v34 = vld [vmem:[#allocation5 + $0x758] sm:$0xff]  ;;  %v518_v35 = vld [vmem:[#allocation5 + $0x8f0] sm:$0xff] }
  0xa1   : > { %1100 = vmatpush.msrb.mxu2 %v362_v36  ;;  %1119 = vmatpush.msrb.mxu3 %v413_v37  ;;  %v563_v36 = vld [vmem:[#allocation5 + $0xa58] sm:$0xff]  ;;  %v614_v37 = vld [vmem:[#allocation5 + $0xbf0] sm:$0xff] }
  0xa2   : > { %1061 = vmatpush.msrb.mxu0 %v263_v38  ;;  %1080 = vmatpush.msrb.mxu1 %v314_v39  ;;  %v464_v38 = vld [vmem:[#allocation5 + $0x740] sm:$0xff]  ;;  %v515_v39 = vld [vmem:[#allocation5 + $0x8d8] sm:$0xff] }
  0xa3   : > { %1101 = vmatpush.msrb.mxu2 %v359_v40  ;;  %1120 = vmatpush.msrb.mxu3 %v410_v41  ;;  %v560_v40 = vld [vmem:[#allocation5 + $0xa40] sm:$0xff]  ;;  %v611_v41 = vld [vmem:[#allocation5 + $0xbd8] sm:$0xff] }
  0xa4   : > { %1062 = vmatpush.msrb.mxu0 %v260_v42  ;;  %1081 = vmatpush.msrb.mxu1 %v311_v43  ;;  %v461_v42 = vld [vmem:[#allocation5 + $0x728] sm:$0xff]  ;;  %v512_v43 = vld [vmem:[#allocation5 + $0x8c0] sm:$0xff] }
  0xa5   : > { %1102 = vmatpush.msrb.mxu2 %v356_v44  ;;  %1121 = vmatpush.msrb.mxu3 %v407_v45  ;;  %v557_v44 = vld [vmem:[#allocation5 + $0xa28] sm:$0xff]  ;;  %v608_v45 = vld [vmem:[#allocation5 + $0xbc0] sm:$0xff] }
  0xa6   : > { %1063 = vmatpush.msrb.mxu0 %v257_v46  ;;  %1082 = vmatpush.msrb.mxu1 %v308_v47  ;;  %v458_v46 = vld [vmem:[#allocation5 + $0x710] sm:$0xff]  ;;  %v509_v47 = vld [vmem:[#allocation5 + $0x8a8] sm:$0xff] }
  0xa7   : > { %1103 = vmatpush.msrb.mxu2 %v353_v48  ;;  %1122 = vmatpush.msrb.mxu3 %v404_v49  ;;  %v554_v48 = vld [vmem:[#allocation5 + $0xa10] sm:$0xff]  ;;  %v605_v49 = vld [vmem:[#allocation5 + $0xba8] sm:$0xff] }
  0xa8   : > { %1064 = vmatpush.msrb.mxu0 %v254_v50  ;;  %1083 = vmatpush.msrb.mxu1 %v305_v51  ;;  %v455_v50 = vld [vmem:[#allocation5 + $0x6f8] sm:$0xff]  ;;  %v506_v51 = vld [vmem:[#allocation5 + $0x890] sm:$0xff] }
  0xa9   : > { %1104 = vmatpush.msrb.mxu2 %v350_v52  ;;  %1123 = vmatpush.msrb.mxu3 %v401_v53  ;;  %v551_v52 = vld [vmem:[#allocation5 + $0x9f8] sm:$0xff]  ;;  %v602_v53 = vld [vmem:[#allocation5 + $0xb90] sm:$0xff] }
  0xaa   : > { %1065 = vmatpush.msrb.mxu0 %v251_v54  ;;  %1084 = vmatpush.msrb.mxu1 %v302_v55  ;;  %v452_v54 = vld [vmem:[#allocation5 + $0x6e0] sm:$0xff]  ;;  %v503_v55 = vld [vmem:[#allocation5 + $0x878] sm:$0xff] }
  0xab   : > { %1105 = vmatpush.msrb.mxu2 %v347_v56  ;;  %1124 = vmatpush.msrb.mxu3 %v398_v57  ;;  %v548_v56 = vld [vmem:[#allocation5 + $0x9e0] sm:$0xff]  ;;  %v599_v57 = vld [vmem:[#allocation5 + $0xb78] sm:$0xff] }
  0xac   : > { %1066 = vmatpush.msrb.mxu0 %v248_v58  ;;  %1085 = vmatpush.msrb.mxu1 %v299_v59  ;;  %v449_v58 = vld [vmem:[#allocation5 + $0x6c8] sm:$0xff]  ;;  %v500_v59 = vld [vmem:[#allocation5 + $0x860] sm:$0xff] }
  0xad   : > { %1106 = vmatpush.msrb.mxu2 %v344_v60  ;;  %1125 = vmatpush.msrb.mxu3 %v395_v61  ;;  %v545_v60 = vld [vmem:[#allocation5 + $0x9c8] sm:$0xff]  ;;  %v596_v61 = vld [vmem:[#allocation5 + $0xb60] sm:$0xff] }
  0xae   : > { %1067 = vmatpush.msrb.mxu0 %v245_v0  ;;  %1086 = vmatpush.msrb.mxu1 %v296_v1  ;;  %v446_v0 = vld [vmem:[#allocation5 + $0x6b0] sm:$0xff]  ;;  %v497_v1 = vld [vmem:[#allocation5 + $0x848] sm:$0xff] }
  0xaf   : > { %1107 = vmatpush.msrb.mxu2 %v341_v2  ;;  %1126 = vmatpush.msrb.mxu3 %v392_v3  ;;  %v542_v2 = vld [vmem:[#allocation5 + $0x9b0] sm:$0xff]  ;;  %v593_v3 = vld [vmem:[#allocation5 + $0xb48] sm:$0xff] }
  0xb0   : > { %1068 = vmatpush.msrb.mxu0 %v242_v6  ;;  %1087 = vmatpush.msrb.mxu1 %v293_v7  ;;  %v443_v6 = vld [vmem:[#allocation5 + $0x698] sm:$0xff]  ;;  %v494_v7 = vld [vmem:[#allocation5 + $0x830] sm:$0xff] }
  0xb1   : > { %1108 = vmatpush.msrb.mxu2 %v338_v8  ;;  %1127 = vmatpush.msrb.mxu3 %v389_v9  ;;  %v539_v8 = vld [vmem:[#allocation5 + $0x998] sm:$0xff]  ;;  %v590_v9 = vld [vmem:[#allocation5 + $0xb30] sm:$0xff] }
  0xb2   : > { %1069 = vmatpush.msrb.mxu0 %v239_v12  ;;  %1088 = vmatpush.msrb.mxu1 %v290_v13  ;;  %v440_v12 = vld [vmem:[#allocation5 + $0x680] sm:$0xff]  ;;  %v491_v13 = vld [vmem:[#allocation5 + $0x818] sm:$0xff] }
  0xb3   : > { %1109 = vmatpush.msrb.mxu2 %v335_v14  ;;  %1128 = vmatpush.msrb.mxu3 %v386_v15  ;;  %v536_v14 = vld [vmem:[#allocation5 + $0x980] sm:$0xff]  ;;  %v587_v15 = vld [vmem:[#allocation5 + $0xb18] sm:$0xff] }
  0xb4   : > { %1070 = vmatpush.msrb.mxu0 %v236_v19  ;;  %1089 = vmatpush.msrb.mxu1 %v287_v20  ;;  %v437_v19 = vld [vmem:[#allocation5 + $0x668] sm:$0xff]  ;;  %v488_v20 = vld [vmem:[#allocation5 + $0x800] sm:$0xff] }
  0xb5   : > { %1110 = vmatpush.msrb.mxu2 %v332_v21  ;;  %1129 = vmatpush.msrb.mxu3 %v383_v22  ;;  %v533_v21 = vld [vmem:[#allocation5 + $0x968] sm:$0xff]  ;;  %v584_v22 = vld [vmem:[#allocation5 + $0xb00] sm:$0xff] }
  0xb6   : > { %1071 = vmatpush.msrb.mxu0 %v233_v25  ;;  %1090 = vmatpush.msrb.mxu1 %v284_v26  ;;  %v434_v25 = vld [vmem:[#allocation5 + $0x650] sm:$0xff]  ;;  %v485_v26 = vld [vmem:[#allocation5 + $0x7e8] sm:$0xff] }
  0xb7   : > { %1111 = vmatpush.msrb.mxu2 %v329_v27  ;;  %1130 = vmatpush.msrb.mxu3 %v380_v28  ;;  %v530_v27 = vld [vmem:[#allocation5 + $0x950] sm:$0xff]  ;;  %v581_v28 = vld [vmem:[#allocation5 + $0xae8] sm:$0xff] }
  0xb8   : > { %1136 = vmatpush.msra.mxu0 %v470_v30  ;;  %1091 = vmatpush.msrb.mxu1 %v281_v32  ;;  %v431_v30 = vld [vmem:[#allocation5 + $0x638] sm:$0xff] }
  0xb9   : > { %1176 = vmatpush.msra.mxu2 %v566_v31  ;;  %1131 = vmatpush.msrb.mxu3 %v377_v33  ;;  %v482_v31 = vld [vmem:[#allocation5 + $0x7d0] sm:$0xff]  ;;  %v527_v32 = vld [vmem:[#allocation5 + $0x938] sm:$0xff] }
  0xba   : > { %1137 = vmatpush.msra.mxu0 %v467_v34  ;;  %1156 = vmatpush.msra.mxu1 %v518_v35  ;;  %v578_v33 = vld [vmem:[#allocation5 + $0xad0] sm:$0xff]  ;;  %v428_v34 = vld [vmem:[#allocation5 + $0x620] sm:$0xff]  ;;  %v479_v35 = vld [vmem:[#allocation5 + $0x7b8] sm:$0xff] }
  0xbb   : > { %1177 = vmatpush.msra.mxu2 %v563_v36  ;;  %1196 = vmatpush.msra.mxu3 %v614_v37  ;;  %v524_v36 = vld [vmem:[#allocation5 + $0x920] sm:$0xff]  ;;  %v575_v37 = vld [vmem:[#allocation5 + $0xab8] sm:$0xff] }
  0xbc   : > { %1138 = vmatpush.msra.mxu0 %v464_v38  ;;  %1157 = vmatpush.msra.mxu1 %v515_v39  ;;  %v425_v38 = vld [vmem:[#allocation5 + $0x608] sm:$0xff]  ;;  %v476_v39 = vld [vmem:[#allocation5 + $0x7a0] sm:$0xff] }
  0xbd   : > { %1178 = vmatpush.msra.mxu2 %v560_v40  ;;  %1197 = vmatpush.msra.mxu3 %v611_v41  ;;  %v521_v40 = vld [vmem:[#allocation5 + $0x908] sm:$0xff]  ;;  %v572_v41 = vld [vmem:[#allocation5 + $0xaa0] sm:$0xff] }
  0xbe   : > { %1139 = vmatpush.msra.mxu0 %v461_v42  ;;  %1158 = vmatpush.msra.mxu1 %v512_v43  ;;  %v662_v42 = vld [vmem:[#allocation5 + $0xd70] sm:$0xff] }
  0xbf   : > { %1179 = vmatpush.msra.mxu2 %v557_v44  ;;  %1198 = vmatpush.msra.mxu3 %v608_v45  ;;  %v758_v43 = vld [vmem:[#allocation5 + $0x1070] sm:$0xff]  ;;  %v473_v44 = vld [vmem:[#allocation5 + $0x788] sm:$0xff] }
  0xc0   : > { %1140 = vmatpush.msra.mxu0 %v458_v46  ;;  %1159 = vmatpush.msra.mxu1 %v509_v47  ;;  %v569_v45 = vld [vmem:[#allocation5 + $0xa88] sm:$0xff]  ;;  %v659_v46 = vld [vmem:[#allocation5 + $0xd58] sm:$0xff]  ;;  %v710_v47 = vld [vmem:[#allocation5 + $0xef0] sm:$0xff] }
  0xc1   : > { %1180 = vmatpush.msra.mxu2 %v554_v48  ;;  %1199 = vmatpush.msra.mxu3 %v605_v49  ;;  %v755_v48 = vld [vmem:[#allocation5 + $0x1058] sm:$0xff]  ;;  %v806_v49 = vld [vmem:[#allocation5 + $0x11f0] sm:$0xff] }
  0xc2   : > { %1141 = vmatpush.msra.mxu0 %v455_v50  ;;  %1160 = vmatpush.msra.mxu1 %v506_v51  ;;  %v656_v50 = vld [vmem:[#allocation5 + $0xd40] sm:$0xff]  ;;  %v707_v51 = vld [vmem:[#allocation5 + $0xed8] sm:$0xff] }
  0xc3   : > { %1181 = vmatpush.msra.mxu2 %v551_v52  ;;  %1200 = vmatpush.msra.mxu3 %v602_v53  ;;  %v752_v52 = vld [vmem:[#allocation5 + $0x1040] sm:$0xff] }
  0xc4   : > { %1142 = vmatpush.msra.mxu0 %v452_v54  ;;  %1161 = vmatpush.msra.mxu1 %v503_v55  ;;  %v704_v53 = vld [vmem:[#allocation5 + $0xec0] sm:$0xff]  ;;  %v749_v54 = vld [vmem:[#allocation5 + $0x1028] sm:$0xff] }
  0xc5   : > { %1182 = vmatpush.msra.mxu2 %v548_v56  ;;  %1201 = vmatpush.msra.mxu3 %v599_v57  ;;  %v800_v55 = vld [vmem:[#allocation5 + $0x11c0] sm:$0xff]  ;;  %v650_v56 = vld [vmem:[#allocation5 + $0xd10] sm:$0xff]  ;;  %v797_v57 = vld [vmem:[#allocation5 + $0x11a8] sm:$0xff] }
  0xc6   : > { %1143 = vmatpush.msra.mxu0 %v449_v58  ;;  %1162 = vmatpush.msra.mxu1 %v500_v59  ;;  %v647_v58 = vld [vmem:[#allocation5 + $0xcf8] sm:$0xff]  ;;  %v698_v59 = vld [vmem:[#allocation5 + $0xe90] sm:$0xff] }
  0xc7   : > { %1183 = vmatpush.msra.mxu2 %v545_v60  ;;  %1202 = vmatpush.msra.mxu3 %v596_v61  ;;  %v743_v60 = vld [vmem:[#allocation5 + $0xff8] sm:$0xff]  ;;  %v794_v61 = vld [vmem:[#allocation5 + $0x1190] sm:$0xff] }
  0xc8   : > { %1144 = vmatpush.msra.mxu0 %v446_v0  ;;  %1163 = vmatpush.msra.mxu1 %v497_v1  ;;  %v644_v0 = vld [vmem:[#allocation5 + $0xce0] sm:$0xff]  ;;  %v695_v1 = vld [vmem:[#allocation5 + $0xe78] sm:$0xff] }
  0xc9   : > { %1184 = vmatpush.msra.mxu2 %v542_v2  ;;  %1203 = vmatpush.msra.mxu3 %v593_v3  ;;  %v740_v2 = vld [vmem:[#allocation5 + $0xfe0] sm:$0xff]  ;;  %v791_v3 = vld [vmem:[#allocation5 + $0x1178] sm:$0xff] }
  0xca   : > { %1145 = vmatpush.msra.mxu0 %v443_v6  ;;  %1164 = vmatpush.msra.mxu1 %v494_v7  ;;  %v692_v6 = vld [vmem:[#allocation5 + $0xe60] sm:$0xff]  ;;  %v737_v7 = vld [vmem:[#allocation5 + $0xfc8] sm:$0xff] }
  0xcb   : > { %1185 = vmatpush.msra.mxu2 %v539_v8  ;;  %1204 = vmatpush.msra.mxu3 %v590_v9  ;;  %v788_v8 = vld [vmem:[#allocation5 + $0x1160] sm:$0xff]  ;;  %v734_v9 = vld [vmem:[#allocation5 + $0xfb0] sm:$0xff] }
  0xcc   : > { %1146 = vmatpush.msra.mxu0 %v440_v12  ;;  %1165 = vmatpush.msra.mxu1 %v491_v13  ;;  %v785_v12 = vld [vmem:[#allocation5 + $0x1148] sm:$0xff]  ;;  %v635_v13 = vld [vmem:[#allocation5 + $0xc98] sm:$0xff] }
  0xcd   : > { %1186 = vmatpush.msra.mxu2 %v536_v14  ;;  %1205 = vmatpush.msra.mxu3 %v587_v15  ;;  %v686_v14 = vld [vmem:[#allocation5 + $0xe30] sm:$0xff] }
  0xce   : > { %1147 = vmatpush.msra.mxu0 %v437_v19  ;;  %1166 = vmatpush.msra.mxu1 %v488_v20  ;;  %v782_v15 = vld [vmem:[#allocation5 + $0x1130] sm:$0xff]  ;;  %v632_v19 = vld [vmem:[#allocation5 + $0xc80] sm:$0xff]  ;;  %v683_v20 = vld [vmem:[#allocation5 + $0xe18] sm:$0xff] }
  0xcf   : > { %1187 = vmatpush.msra.mxu2 %v533_v21  ;;  %1206 = vmatpush.msra.mxu3 %v584_v22  ;;  %v728_v21 = vld [vmem:[#allocation5 + $0xf80] sm:$0xff]  ;;  %v779_v22 = vld [vmem:[#allocation5 + $0x1118] sm:$0xff] }
  0xd0   : > { %1148 = vmatpush.msra.mxu0 %v434_v25  ;;  %1167 = vmatpush.msra.mxu1 %v485_v26  ;;  %v629_v25 = vld [vmem:[#allocation5 + $0xc68] sm:$0xff]  ;;  %v680_v26 = vld [vmem:[#allocation5 + $0xe00] sm:$0xff] }
  0xd1   : > { %1188 = vmatpush.msra.mxu2 %v530_v27  ;;  %1207 = vmatpush.msra.mxu3 %v581_v28  ;;  %v2093_v27 = vld [vmem:[#allocation7] sm:$0x7]  ;;  %v725_v28 = vld [vmem:[#allocation5 + $0xf68] sm:$0xff] }
  0xd2   : > { %1149 = vmatpush.msra.mxu0 %v431_v30  ;;  %1168 = vmatpush.msra.mxu1 %v482_v31  ;;  %v776_v30 = vld [vmem:[#allocation5 + $0x1100] sm:$0xff]  ;;  %v626_v31 = vld [vmem:[#allocation5 + $0xc50] sm:$0xff] }
  0xd3   : > { %1189 = vmatpush.msra.mxu2 %v527_v32  ;;  %1208 = vmatpush.msra.mxu3 %v578_v33  ;;  %v677_v32 = vld [vmem:[#allocation5 + $0xde8] sm:$0xff]  ;;  %v722_v33 = vld [vmem:[#allocation5 + $0xf50] sm:$0xff] }
  0xd4   : > { %1150 = vmatpush.msra.mxu0 %v428_v34  ;;  %1169 = vmatpush.msra.mxu1 %v479_v35  ;;  %v773_v34 = vld [vmem:[#allocation5 + $0x10e8] sm:$0xff]  ;;  %v810_v35 = vperm.slane %v2093_v27, 0 }
  0xd5   : > { %1190 = vmatpush.msra.mxu2 %v524_v36  ;;  %1209 = vmatpush.msra.mxu3 %v575_v37  ;;  %v623_v36 = vld [vmem:[#allocation5 + $0xc38] sm:$0xff]  ;;  %v674_v37 = vld [vmem:[#allocation5 + $0xdd0] sm:$0xff] }
  0xd6   : > { %1151 = vmatpush.msra.mxu0 %v425_v38  ;;  %1170 = vmatpush.msra.mxu1 %v476_v39  ;;  %v719_v39 = vld [vmem:[#allocation5 + $0xf38] sm:$0xff] }
  0xd7   : > { %1191 = vmatpush.msra.mxu2 %v521_v40  ;;  %1210 = vmatpush.msra.mxu3 %v572_v41  ;;  %v770_v40 = vld [vmem:[#allocation5 + $0x10d0] sm:$0xff]  ;;  %v620_v41 = vld [vmem:[#allocation5 + $0xc20] sm:$0xff] }
  0xd8   : > { %1072 = vmatmul.f32.vlgmr.msrb.gmra.mxu0 %v2038_v62  ;;  %1112 = vmatmul.f32.vlgmr.msrb.gmra.mxu2 %v2041_v63  ;;  %v803_v62 = vld [vmem:[#allocation5 + $0x11d8] sm:$0xff]  ;;  %v653_v63 = vld [vmem:[#allocation5 + $0xd28] sm:$0xff] }
  0xd9   : > { %1216 = vmatpush.msrb.mxu0 %v662_v42  ;;  %1256 = vmatpush.msrb.mxu2 %v758_v43  ;;  %v671_v42 = vld [vmem:[#allocation5 + $0xdb8] sm:$0xff]  ;;  %v716_v43 = vld [vmem:[#allocation5 + $0xf20] sm:$0xff] }
  0xda   : > { %1171 = vmatpush.msra.mxu1 %v473_v44  ;;  %1211 = vmatpush.msra.mxu3 %v569_v45  ;;  %v767_v44 = vld [vmem:[#allocation5 + $0x10b8] sm:$0xff] }
  0xdb   : > { %1092 = vmatmul.f32.vlgmr.msrb.gmra.mxu1 %v2046_v4  ;;  %1132 = vmatmul.f32.vlgmr.msrb.gmra.mxu3 %v2049_v5  ;;  %v701_v4 = vld [vmem:[#allocation5 + $0xea8] sm:$0xff]  ;;  %v746_v5 = vld [vmem:[#allocation5 + $0x1010] sm:$0xff] }
  0xdc   : > { %1217 = vmatpush.msrb.mxu0 %v659_v46  ;;  %1236 = vmatpush.msrb.mxu1 %v710_v47  ;;  %v617_v46 = vld [vmem:[#allocation5 + $0xc08] sm:$0xff]  ;;  %v668_v47 = vld [vmem:[#allocation5 + $0xda0] sm:$0xff] }
  0xdd   : > { %1257 = vmatpush.msrb.mxu2 %v755_v48  ;;  %1276 = vmatpush.msrb.mxu3 %v806_v49  ;;  %v713_v49 = vld [vmem:[#allocation5 + $0xf08] sm:$0xff] }
  0xde   : > { %1218 = vmatpush.msrb.mxu0 %v656_v50  ;;  %1237 = vmatpush.msrb.mxu1 %v707_v51  ;;  %v764_v50 = vld [vmem:[#allocation5 + $0x10a0] sm:$0xff]  ;;  %v279_v51 = vld [vmem:[#allocation5 + $0x178] sm:$0xff] }
  0xdf   : > { %1258 = vmatpush.msrb.mxu2 %v752_v52  ;;  %1277 = vmatpush.msrb.mxu3 %v803_v62  ;;  %v375_v52 = vld [vmem:[#allocation5 + $0x478] sm:$0xff] }
  0xe0   : > { %1219 = vmatpush.msrb.mxu0 %v653_v63  ;;  %1238 = vmatpush.msrb.mxu1 %v704_v53  ;;  %v665_v63 = vld [vmem:[#allocation5 + $0xd88] sm:$0xff] }
  0xe1   : > { %1259 = vmatpush.msrb.mxu2 %v749_v54  ;;  %1278 = vmatpush.msrb.mxu3 %v800_v55  ;;  %v761_v53 = vld [vmem:[#allocation5 + $0x1088] sm:$0xff]  ;;  %v276_v55 = vld [vmem:[#allocation5 + $0x160] sm:$0xff] }
  0xe2   : > { %1192 = vmatmul.f32.vlgmr.msra.gmra.mxu2 %v2054_v18  ;;  %1220 = vmatpush.msrb.mxu0 %v650_v56  ;;  %v641_v18 = vld [vmem:[#allocation5 + $0xcc8] sm:$0xff]  ;;  %v327_v56 = vld [vmem:[#allocation5 + $0x2f8] sm:$0xff] }
  0xe3   : > { %1239 = vmatpush.msrb.mxu1 %v701_v4  ;;  %1260 = vmatpush.msrb.mxu2 %v746_v5  ;;  %v372_v4 = vld [vmem:[#allocation5 + $0x460] sm:$0xff]  ;;  %v423_v5 = vld [vmem:[#allocation5 + $0x5f8] sm:$0xff] }
  0xe4   : > { %1279 = vmatpush.msrb.mxu3 %v797_v57  ;;  %1152 = vmatmul.f32.vlgmr.msra.gmra.mxu0 %v2057_v23  ;;  %v638_v23 = vld [vmem:[#allocation5 + $0xcb0] sm:$0xff] }
  0xe5   : > { %1212 = vmatmul.f32.vlgmr.msra.gmra.mxu3 %v2061_v24  ;;  %1221 = vmatpush.msrb.mxu0 %v647_v58  ;;  %v689_v24 = vld [vmem:[#allocation5 + $0xe48] sm:$0xff] }
  0xe6   : > { %1240 = vmatpush.msrb.mxu1 %v698_v59  ;;  %1261 = vmatpush.msrb.mxu2 %v743_v60  ;;  %v273_v58 = vld [vmem:[#allocation5 + $0x148] sm:$0xff]  ;;  %v324_v59 = vld [vmem:[#allocation5 + $0x2e0] sm:$0xff] }
  0xe7   : > { %1280 = vmatpush.msrb.mxu3 %v794_v61  ;;  %1172 = vmatmul.f32.vlgmr.msra.gmra.mxu1 %v2065_v29  ;;  %v731_v29 = vld [vmem:[#allocation5 + $0xf98] sm:$0xff]  ;;  %v270_v61 = vld [vmem:[#allocation5 + $0x130] sm:$0xff] }
  0xe8   : > { %1222 = vmatpush.msrb.mxu0 %v644_v0  ;;  %1241 = vmatpush.msrb.mxu1 %v695_v1  ;;  %v321_v0 = vld [vmem:[#allocation5 + $0x2c8] sm:$0xff]  ;;  %v366_v1 = vld [vmem:[#allocation5 + $0x430] sm:$0xff] }
  0xe9   : > { %1262 = vmatpush.msrb.mxu2 %v740_v2  ;;  %1281 = vmatpush.msrb.mxu3 %v791_v3  ;;  %v417_v2 = vld [vmem:[#allocation5 + $0x5c8] sm:$0xff] }
  0xea   : > { %1223 = vmatpush.msrb.mxu0 %v641_v18  ;;  %1242 = vmatpush.msrb.mxu1 %v692_v6  ;;  %v363_v6 = vld [vmem:[#allocation5 + $0x418] sm:$0xff] }
  0xeb   : > { %1263 = vmatpush.msrb.mxu2 %v737_v7  ;;  %1282 = vmatpush.msrb.mxu3 %v788_v8  ;;  %v414_v7 = vld [vmem:[#allocation5 + $0x5b0] sm:$0xff]  ;;  %v264_v8 = vld [vmem:[#allocation5 + $0x100] sm:$0xff] }
  0xec   : > { %1224 = vmatpush.msrb.mxu0 %v638_v23  ;;  %1243 = vmatpush.msrb.mxu1 %v689_v24  ;;  %v315_v23 = vld [vmem:[#allocation5 + $0x298] sm:$0xff]  ;;  %v360_v24 = vld [vmem:[#allocation5 + $0x400] sm:$0xff] }
  0xed   : > { %1264 = vmatpush.msrb.mxu2 %v734_v9  ;;  %1283 = vmatpush.msrb.mxu3 %v785_v12  ;;  %v411_v9 = vld [vmem:[#allocation5 + $0x598] sm:$0xff] }
  0xee   : > { %1225 = vmatpush.msrb.mxu0 %v635_v13  ;;  %1244 = vmatpush.msrb.mxu1 %v686_v14  ;;  %v261_v13 = vld [vmem:[#allocation5 + $0xe8] sm:$0xff]  ;;  %v312_v14 = vld [vmem:[#allocation5 + $0x280] sm:$0xff] }
  0xef   : > { %1265 = vmatpush.msrb.mxu2 %v731_v29  ;;  %1284 = vmatpush.msrb.mxu3 %v782_v15  ;;  %v833_v38 = vpop.f32.mrf.mxu0  ;;  %v357_v15 = vld [vmem:[#allocation5 + $0x3e8] sm:$0xff] }
  0xf0   : > { %1226 = vmatpush.msrb.mxu0 %v632_v19  ;;  %1245 = vmatpush.msrb.mxu1 %v683_v20  ;;  %v834_v45 = vadd.f32 %v833_v38, %v810_v35  ;;  %v408_v19 = vld [vmem:[#allocation5 + $0x580] sm:$0xff]  ;;  %v258_v20 = vld [vmem:[#allocation5 + $0xd0] sm:$0xff]  ;;  %v303_v35 = vld [vmem:[#allocation5 + $0x238] sm:$0xff] }
  0xf1   : > { %1266 = vmatpush.msrb.mxu2 %v728_v21  ;;  %1285 = vmatpush.msrb.mxu3 %v779_v22  ;;  %v309_v21 = vld [vmem:[#allocation5 + $0x268] sm:$0xff]  ;;  %v399_v38 = vld [vmem:[#allocation5 + $0x538] sm:$0xff] }
  0xf2   : > { %1227 = vmatpush.msrb.mxu0 %v629_v25  ;;  %1246 = vmatpush.msrb.mxu1 %v680_v26  ;;  %v853_v48 = vpop.f32.mrf.mxu1  ;;  %v354_v25 = vld [vmem:[#allocation5 + $0x3d0] sm:$0xff]  ;;  %v405_v26 = vld [vmem:[#allocation5 + $0x568] sm:$0xff] }
  0xf3   : > { %1267 = vmatpush.msrb.mxu2 %v725_v28  ;;  %1286 = vmatpush.msrb.mxu3 %v776_v30  ;;  %v854_v62 = vadd.f32 %v853_v48, %v834_v45  ;;  %v255_v30 = vld [vmem:[#allocation5 + $0xb8] sm:$0xff]  ;;  %v297_v45 = vld [vmem:[#allocation5 + $0x208] sm:$0xff] }
  0xf4   : > { %1228 = vmatpush.msrb.mxu0 %v626_v31  ;;  %1247 = vmatpush.msrb.mxu1 %v677_v32  ;;  %v306_v31 = vld [vmem:[#allocation5 + $0x250] sm:$0xff]  ;;  %v351_v32 = vld [vmem:[#allocation5 + $0x3b8] sm:$0xff]  ;;  %v393_v48 = vld [vmem:[#allocation5 + $0x508] sm:$0xff] }
  0xf5   : > { %1268 = vmatpush.msrb.mxu2 %v722_v33  ;;  %1287 = vmatpush.msrb.mxu3 %v773_v34  ;;  %v873_v54 = vpop.f32.mrf.mxu2  ;;  %v402_v33 = vld [vmem:[#allocation5 + $0x550] sm:$0xff]  ;;  %v252_v34 = vld [vmem:[#allocation5 + $0xa0] sm:$0xff] }
  0xf6   : > { %1229 = vmatpush.msrb.mxu0 %v623_v36  ;;  %1248 = vmatpush.msrb.mxu1 %v674_v37  ;;  %v874_v57 = vadd.f32 %v873_v54, %v854_v62  ;;  %v348_v37 = vld [vmem:[#allocation5 + $0x3a0] sm:$0xff]  ;;  %v390_v62 = vld [vmem:[#allocation5 + $0x4f0] sm:$0xff]  ;;  %v291_v54 = vld [vmem:[#allocation5 + $0x1d8] sm:$0xff] }
  0xf7   : > { %1269 = vmatpush.msrb.mxu2 %v719_v39  ;;  %1288 = vmatpush.msrb.mxu3 %v770_v40  ;;  %v249_v40 = vld [vmem:[#allocation5 + $0x88] sm:$0xff] }
  0xf8   : > { %1230 = vmatpush.msrb.mxu0 %v620_v41  ;;  %1249 = vmatpush.msrb.mxu1 %v671_v42  ;;  %v893_v60 = vpop.f32.mrf.mxu3  ;;  %v300_v41 = vld [vmem:[#allocation5 + $0x220] sm:$0xff]  ;;  %v345_v42 = vld [vmem:[#allocation5 + $0x388] sm:$0xff] }
  0xf9   : > { %1270 = vmatpush.msrb.mxu2 %v716_v43  ;;  %1289 = vmatpush.msrb.mxu3 %v767_v44  ;;  %v894_v3 = vadd.f32 %v893_v60, %v874_v57  ;;  %v396_v43 = vld [vmem:[#allocation5 + $0x520] sm:$0xff]  ;;  %v246_v44 = vld [vmem:[#allocation5 + $0x70] sm:$0xff] }
  0xfa   : > { %1231 = vmatpush.msrb.mxu0 %v617_v46  ;;  %1250 = vmatpush.msrb.mxu1 %v668_v47  ;;  %v342_v47 = vld [vmem:[#allocation5 + $0x370] sm:$0xff]  ;;  %v288_v57 = vld [vmem:[#allocation5 + $0x1c0] sm:$0xff] }
  0xfb   : > { %1271 = vmatpush.msrb.mxu2 %v713_v49  ;;  %1290 = vmatpush.msrb.mxu3 %v764_v50  ;;  %v913_v18 = vpop.f32.mrf.mxu0  ;;  %v243_v49 = vld [vmem:[#allocation5 + $0x58] sm:$0xff]  ;;  %v294_v50 = vld [vmem:[#allocation5 + $0x1f0] sm:$0xff] }
  0xfc   : > { %1232 = vmatmul.f32.vlgmr.msrb.gmra.mxu0 %v2070_v10  ;;  %1272 = vmatmul.f32.vlgmr.msrb.gmra.mxu2 %v2073_v11  ;;  %v369_v10 = vld [vmem:[#allocation5 + $0x448] sm:$0xff]  ;;  %v420_v11 = vld [vmem:[#allocation5 + $0x5e0] sm:$0xff]  ;;  %v914_v12 = vadd.f32 %v913_v18, %v894_v3  ;;  %v471_v3 = vld [vmem:[#allocation5 + $0x778] sm:$0xff] }
  0xfd   : > { %1296 = vmatpush.msra.mxu0 %v279_v51  ;;  %1336 = vmatpush.msra.mxu2 %v375_v52  ;;  %v339_v52 = vld [vmem:[#allocation5 + $0x358] sm:$0xff]  ;;  %v378_v18 = vld [vmem:[#allocation5 + $0x490] sm:$0xff] }
  0xfe   : > { %1251 = vmatpush.msrb.mxu1 %v665_v63  ;;  %1291 = vmatpush.msrb.mxu3 %v761_v53  ;;  %v933_v29 = vpop.f32.mrf.mxu1  ;;  %v240_v53 = vld [vmem:[#allocation5 + $0x40] sm:$0xff] }
  0xff   : > { %1252 = vmatmul.f32.vlgmr.msrb.gmra.mxu1 %v2078_v16  ;;  %1292 = vmatmul.f32.vlgmr.msrb.gmra.mxu3 %v2081_v17  ;;  %v267_v16 = vld [vmem:[#allocation5 + $0x118] sm:$0xff]  ;;  %v318_v17 = vld [vmem:[#allocation5 + $0x2b0] sm:$0xff]  ;;  %v934_v22 = vadd.f32 %v933_v29, %v914_v12  ;;  %v953_v28 = vpop.f32.mrf.mxu2  ;;  %v465_v12 = vld [vmem:[#allocation5 + $0x748] sm:$0xff] }
 0x100   : > { %1297 = vmatpush.msra.mxu0 %v276_v55  ;;  %1316 = vmatpush.msra.mxu1 %v327_v56  ;;  %v336_v55 = vld [vmem:[#allocation5 + $0x340] sm:$0xff]  ;;  %v387_v56 = vld [vmem:[#allocation5 + $0x4d8] sm:$0xff] }
 0x101   : > { %1337 = vmatpush.msra.mxu2 %v372_v4  ;;  %1356 = vmatpush.msra.mxu3 %v423_v5  ;;  %v954_v36 = vadd.f32 %v953_v28, %v934_v22  ;;  %v237_v5 = vld [vmem:[#allocation5 + $0x28] sm:$0xff]  ;;  %v612_v29 = vld [vmem:[#allocation5 + $0xbe0] sm:$0xff]  ;;  %v459_v22 = vld [vmem:[#allocation5 + $0x718] sm:$0xff] }
 0x102   : > { %1298 = vmatpush.msra.mxu0 %v273_v58  ;;  %1317 = vmatpush.msra.mxu1 %v324_v59  ;;  %v973_v39 = vpop.f32.mrf.mxu3  ;;  %v333_v58 = vld [vmem:[#allocation5 + $0x328] sm:$0xff]  ;;  %v384_v59 = vld [vmem:[#allocation5 + $0x4c0] sm:$0xff]  ;;  %v606_v28 = vld [vmem:[#allocation5 + $0xbb0] sm:$0xff] }
 0x103   : > { %1338 = vmatpush.msra.mxu2 %v369_v10  ;;  %1357 = vmatpush.msra.mxu3 %v420_v11  ;;  %v974_v46 = vadd.f32 %v973_v39, %v954_v36  ;;  %v234_v10 = vld [vmem:[#allocation5 + $0x10] sm:$0xff]  ;;  %v285_v11 = vld [vmem:[#allocation5 + $0x1a8] sm:$0xff] }
 0x104   : > { %1299 = vmatpush.msra.mxu0 %v270_v61  ;;  %1318 = vmatpush.msra.mxu1 %v321_v0  ;;  %v330_v0 = vld [vmem:[#allocation5 + $0x310] sm:$0xff]  ;;  %v549_v36 = vld [vmem:[#allocation5 + $0x9e8] sm:$0xff] }
 0x105   : > { %1339 = vmatpush.msra.mxu2 %v366_v1  ;;  %1358 = vmatpush.msra.mxu3 %v417_v2  ;;  %v381_v1 = vld [vmem:[#allocation5 + $0x4a8] sm:$0xff] }
 0x106   : > { %1300 = vmatpush.msra.mxu0 %v267_v16  ;;  %1319 = vmatpush.msra.mxu1 %v318_v17  ;;  %v567_v16 = vld [vmem:[#allocation5 + $0xa78] sm:$0xff]  ;;  %v282_v17 = vld [vmem:[#allocation5 + $0x190] sm:$0xff]  ;;  %v501_v39 = vld [vmem:[#allocation5 + $0x868] sm:$0xff] }
 0x107   : > { %1340 = vmatpush.msra.mxu2 %v363_v6  ;;  %1359 = vmatpush.msra.mxu3 %v414_v7  ;;  %v468_v7 = vld [vmem:[#allocation5 + $0x760] sm:$0xff] }
 0x108   : > { %1301 = vmatpush.msra.mxu0 %v264_v8  ;;  %1320 = vmatpush.msra.mxu1 %v315_v23  ;;  %v519_v8 = vld [vmem:[#allocation5 + $0x8f8] sm:$0xff] }
 0x109   : > { %1341 = vmatpush.msra.mxu2 %v360_v24  ;;  %1360 = vmatpush.msra.mxu3 %v411_v9  ;;  %v564_v24 = vld [vmem:[#allocation5 + $0xa60] sm:$0xff]  ;;  %v615_v9 = vld [vmem:[#allocation5 + $0xbf8] sm:$0xff] }
 0x10a   : > { %1302 = vmatpush.msra.mxu0 %v261_v13  ;;  %1321 = vmatpush.msra.mxu1 %v312_v14  ;;  %v516_v13 = vld [vmem:[#allocation5 + $0x8e0] sm:$0xff]  ;;  %v561_v14 = vld [vmem:[#allocation5 + $0xa48] sm:$0xff] }
 0x10b   : > { %1342 = vmatpush.msra.mxu2 %v357_v15  ;;  %1361 = vmatpush.msra.mxu3 %v408_v19  ;;  %v462_v15 = vld [vmem:[#allocation5 + $0x730] sm:$0xff]  ;;  %v513_v19 = vld [vmem:[#allocation5 + $0x8c8] sm:$0xff] }
 0x10c   : > { %1303 = vmatpush.msra.mxu0 %v258_v20  ;;  %1322 = vmatpush.msra.mxu1 %v309_v21  ;;  %v558_v20 = vld [vmem:[#allocation5 + $0xa30] sm:$0xff]  ;;  %v609_v21 = vld [vmem:[#allocation5 + $0xbc8] sm:$0xff] }
 0x10d   : > { %1343 = vmatpush.msra.mxu2 %v354_v25  ;;  %1362 = vmatpush.msra.mxu3 %v405_v26  ;;  %v510_v25 = vld [vmem:[#allocation5 + $0x8b0] sm:$0xff]  ;;  %v555_v26 = vld [vmem:[#allocation5 + $0xa18] sm:$0xff] }
 0x10e   : > { %1304 = vmatpush.msra.mxu0 %v255_v30  ;;  %1323 = vmatpush.msra.mxu1 %v306_v31  ;;  %v456_v30 = vld [vmem:[#allocation5 + $0x700] sm:$0xff]  ;;  %v507_v31 = vld [vmem:[#allocation5 + $0x898] sm:$0xff] }
 0x10f   : > { %1344 = vmatpush.msra.mxu2 %v351_v32  ;;  %1363 = vmatpush.msra.mxu3 %v402_v33  ;;  %v552_v32 = vld [vmem:[#allocation5 + $0xa00] sm:$0xff]  ;;  %v603_v33 = vld [vmem:[#allocation5 + $0xb98] sm:$0xff] }
 0x110   : > { %1305 = vmatpush.msra.mxu0 %v252_v34  ;;  %1324 = vmatpush.msra.mxu1 %v303_v35  ;;  %v453_v34 = vld [vmem:[#allocation5 + $0x6e8] sm:$0xff]  ;;  %v504_v35 = vld [vmem:[#allocation5 + $0x880] sm:$0xff] }
 0x111   : > { %1345 = vmatpush.msra.mxu2 %v348_v37  ;;  %1364 = vmatpush.msra.mxu3 %v399_v38  ;;  %v600_v37 = vld [vmem:[#allocation5 + $0xb80] sm:$0xff]  ;;  %v450_v38 = vld [vmem:[#allocation5 + $0x6d0] sm:$0xff] }
 0x112   : > { %1306 = vmatpush.msra.mxu0 %v249_v40  ;;  %1325 = vmatpush.msra.mxu1 %v300_v41  ;;  %v546_v40 = vld [vmem:[#allocation5 + $0x9d0] sm:$0xff]  ;;  %v597_v41 = vld [vmem:[#allocation5 + $0xb68] sm:$0xff] }
 0x113   : > { %1346 = vmatpush.msra.mxu2 %v345_v42  ;;  %1365 = vmatpush.msra.mxu3 %v396_v43  ;;  %v993_v51 = vpop.f32.mrf.mxu0  ;;  %v447_v42 = vld [vmem:[#allocation5 + $0x6b8] sm:$0xff]  ;;  %v498_v43 = vld [vmem:[#allocation5 + $0x850] sm:$0xff] }
 0x114   : > { %1307 = vmatpush.msra.mxu0 %v246_v44  ;;  %1326 = vmatpush.msra.mxu1 %v297_v45  ;;  %v994_v63 = vadd.f32 %v993_v51, %v974_v46  ;;  %v543_v44 = vld [vmem:[#allocation5 + $0x9b8] sm:$0xff]  ;;  %v594_v45 = vld [vmem:[#allocation5 + $0xb50] sm:$0xff]  ;;  %v444_v46 = vld [vmem:[#allocation5 + $0x6a0] sm:$0xff] }
 0x115   : > { %1347 = vmatpush.msra.mxu2 %v342_v47  ;;  %1366 = vmatpush.msra.mxu3 %v393_v48  ;;  %v495_v47 = vld [vmem:[#allocation5 + $0x838] sm:$0xff]  ;;  %v540_v48 = vld [vmem:[#allocation5 + $0x9a0] sm:$0xff] }
 0x116   : > { %1308 = vmatpush.msra.mxu0 %v243_v49  ;;  %1327 = vmatpush.msra.mxu1 %v294_v50  ;;  %v1013_v4 = vpop.f32.mrf.mxu1  ;;  %v591_v49 = vld [vmem:[#allocation5 + $0xb38] sm:$0xff]  ;;  %v441_v50 = vld [vmem:[#allocation5 + $0x688] sm:$0xff]  ;;  %v492_v51 = vld [vmem:[#allocation5 + $0x820] sm:$0xff] }
 0x117   : > { %1348 = vmatpush.msra.mxu2 %v339_v52  ;;  %1367 = vmatpush.msra.mxu3 %v390_v62  ;;  %v1014_v60 = vadd.f32 %v1013_v4, %v994_v63  ;;  %v537_v52 = vld [vmem:[#allocation5 + $0x988] sm:$0xff]  ;;  %v588_v62 = vld [vmem:[#allocation5 + $0xb20] sm:$0xff]  ;;  %v438_v63 = vld [vmem:[#allocation5 + $0x670] sm:$0xff] }
 0x118   : > { %1309 = vmatpush.msra.mxu0 %v240_v53  ;;  %1328 = vmatpush.msra.mxu1 %v291_v54  ;;  %v489_v53 = vld [vmem:[#allocation5 + $0x808] sm:$0xff]  ;;  %v534_v54 = vld [vmem:[#allocation5 + $0x970] sm:$0xff] }
 0x119   : > { %1349 = vmatpush.msra.mxu2 %v336_v55  ;;  %1368 = vmatpush.msra.mxu3 %v387_v56  ;;  %v1033_v61 = vpop.f32.mrf.mxu2  ;;  %v585_v55 = vld [vmem:[#allocation5 + $0xb08] sm:$0xff]  ;;  %v435_v56 = vld [vmem:[#allocation5 + $0x658] sm:$0xff]  ;;  %v486_v4 = vld [vmem:[#allocation5 + $0x7f0] sm:$0xff] }
 0x11a   : > { %1310 = vmatpush.msra.mxu0 %v237_v5  ;;  %1329 = vmatpush.msra.mxu1 %v288_v57  ;;  %v1034_v2 = vadd.f32 %v1033_v61, %v1014_v60  ;;  %v531_v5 = vld [vmem:[#allocation5 + $0x958] sm:$0xff]  ;;  %v582_v57 = vld [vmem:[#allocation5 + $0xaf0] sm:$0xff]  ;;  %v528_v60 = vld [vmem:[#allocation5 + $0x940] sm:$0xff] }
 0x11b   : > { %1350 = vmatpush.msra.mxu2 %v333_v58  ;;  %1369 = vmatpush.msra.mxu3 %v384_v59  ;;  %v432_v58 = vld [vmem:[#allocation5 + $0x640] sm:$0xff]  ;;  %v483_v59 = vld [vmem:[#allocation5 + $0x7d8] sm:$0xff] }
 0x11c   : > { %1311 = vmatpush.msra.mxu0 %v234_v10  ;;  %1330 = vmatpush.msra.mxu1 %v285_v11  ;;  %v1053_v6 = vpop.f32.mrf.mxu3  ;;  %v579_v10 = vld [vmem:[#allocation5 + $0xad8] sm:$0xff]  ;;  %v429_v11 = vld [vmem:[#allocation5 + $0x628] sm:$0xff]  ;;  %v480_v61 = vld [vmem:[#allocation5 + $0x7c0] sm:$0xff] }
 0x11d   : > { %1351 = vmatpush.msra.mxu2 %v330_v0  ;;  %1370 = vmatpush.msra.mxu3 %v381_v1  ;;  %v1054_v23 = vadd.f32 %v1053_v6, %v1034_v2  ;;  %v525_v0 = vld [vmem:[#allocation5 + $0x928] sm:$0xff]  ;;  %v576_v1 = vld [vmem:[#allocation5 + $0xac0] sm:$0xff]  ;;  %v426_v2 = vld [vmem:[#allocation5 + $0x610] sm:$0xff] }
 0x11e   : > { %1376 = vmatpush.msrb.mxu0 %v471_v3  ;;  %1331 = vmatpush.msra.mxu1 %v282_v17  ;;  %v477_v3 = vld [vmem:[#allocation5 + $0x7a8] sm:$0xff]  ;;  %v759_v6 = vld [vmem:[#allocation5 + $0x1078] sm:$0xff] }
 0x11f   : > { %1416 = vmatpush.msrb.mxu2 %v567_v16  ;;  %1371 = vmatpush.msra.mxu3 %v378_v18  ;;  %1536 = vst [vmem:[%s2103_s8] sm:$0xff] %v1054_v23  ;;  %v522_v16 = vld [vmem:[#allocation5 + $0x910] sm:$0xff]  ;;  %v573_v17 = vld [vmem:[#allocation5 + $0xaa8] sm:$0xff]  ;;  %v663_v18 = vld [vmem:[#allocation5 + $0xd78] sm:$0xff] }
 0x120   : > { %1377 = vmatpush.msrb.mxu0 %v468_v7  ;;  %1396 = vmatpush.msrb.mxu1 %v519_v8  ;;  %v474_v7 = vld [vmem:[#allocation5 + $0x790] sm:$0xff]  ;;  %v1731_v23 = vld [vmem:[%s2027_s23] sm:$0xff] }
 0x121   : > { %1417 = vmatpush.msrb.mxu2 %v564_v24  ;;  %1436 = vmatpush.msrb.mxu3 %v615_v9  ;;  %v570_v8 = vld [vmem:[#allocation5 + $0xa90] sm:$0xff]  ;;  %v660_v9 = vld [vmem:[#allocation5 + $0xd60] sm:$0xff] }
 0x122   : > { %1378 = vmatpush.msrb.mxu0 %v465_v12  ;;  %1397 = vmatpush.msrb.mxu1 %v516_v13  ;;  %v1732_v24 = vld [vmem:[%s2027_s23 + $0x10] sm:$0xff]  ;;  %v711_v12 = vld [vmem:[#allocation5 + $0xef8] sm:$0xff]  ;;  %v756_v13 = vld [vmem:[#allocation5 + $0x1060] sm:$0xff] }
 0x123   : > { %1418 = vmatpush.msrb.mxu2 %v561_v14  ;;  %1437 = vmatpush.msrb.mxu3 %v612_v29  ;;  %v807_v14 = vld [vmem:[#allocation5 + $0x11f8] sm:$0xff]  ;;  %v1733_v29 = vld [vmem:[%s2027_s23 + $0x8] sm:$0xff] }
 0x124   : > { %1379 = vmatpush.msrb.mxu0 %v462_v15  ;;  %1398 = vmatpush.msrb.mxu1 %v513_v19  ;;  %v1734_v15 = vld [vmem:[%s2027_s23 + $0x18] sm:$0xff]  ;;  %v657_v19 = vld [vmem:[#allocation5 + $0xd48] sm:$0xff] }
 0x125   : > { %1419 = vmatpush.msrb.mxu2 %v558_v20  ;;  %1438 = vmatpush.msrb.mxu3 %v609_v21  ;;  %v708_v20 = vld [vmem:[#allocation5 + $0xee0] sm:$0xff]  ;;  %v753_v21 = vld [vmem:[#allocation5 + $0x1048] sm:$0xff] }
 0x126   : > { %1380 = vmatpush.msrb.mxu0 %v459_v22  ;;  %1399 = vmatpush.msrb.mxu1 %v510_v25  ;;  %v804_v22 = vld [vmem:[#allocation5 + $0x11e0] sm:$0xff]  ;;  %v654_v25 = vld [vmem:[#allocation5 + $0xd30] sm:$0xff] }
 0x127   : > { %1420 = vmatpush.msrb.mxu2 %v555_v26  ;;  %1439 = vmatpush.msrb.mxu3 %v606_v28  ;;  %v705_v26 = vld [vmem:[#allocation5 + $0xec8] sm:$0xff]  ;;  %v750_v28 = vld [vmem:[#allocation5 + $0x1030] sm:$0xff] }
 0x128   : > { %1381 = vmatpush.msrb.mxu0 %v456_v30  ;;  %1400 = vmatpush.msrb.mxu1 %v507_v31  ;;  %v801_v30 = vld [vmem:[#allocation5 + $0x11c8] sm:$0xff]  ;;  %v651_v31 = vld [vmem:[#allocation5 + $0xd18] sm:$0xff] }
 0x129   : > { %1421 = vmatpush.msrb.mxu2 %v552_v32  ;;  %1440 = vmatpush.msrb.mxu3 %v603_v33  ;;  %v702_v32 = vld [vmem:[#allocation5 + $0xeb0] sm:$0xff]  ;;  %v747_v33 = vld [vmem:[#allocation5 + $0x1018] sm:$0xff] }
 0x12a   : > { %1382 = vmatpush.msrb.mxu0 %v453_v34  ;;  %1401 = vmatpush.msrb.mxu1 %v504_v35  ;;  %v798_v34 = vld [vmem:[#allocation5 + $0x11b0] sm:$0xff] }
 0x12b   : > { %1422 = vmatpush.msrb.mxu2 %v549_v36  ;;  %1441 = vmatpush.msrb.mxu3 %v600_v37  ;;  %v1735_v35 = vld [vmem:[%s2027_s23 + $0x30] sm:$0xff]  ;;  %v648_v36 = vld [vmem:[#allocation5 + $0xd00] sm:$0xff]  ;;  %v699_v37 = vld [vmem:[#allocation5 + $0xe98] sm:$0xff] }
 0x12c   : > { %1383 = vmatpush.msrb.mxu0 %v450_v38  ;;  %1402 = vmatpush.msrb.mxu1 %v501_v39  ;;  %v744_v38 = vld [vmem:[#allocation5 + $0x1000] sm:$0xff] }
 0x12d   : > { %1423 = vmatpush.msrb.mxu2 %v546_v40  ;;  %1442 = vmatpush.msrb.mxu3 %v597_v41  ;;  %v1736_v39 = vld [vmem:[%s2027_s23 + $0x20] sm:$0xff]  ;;  %v795_v40 = vld [vmem:[#allocation5 + $0x1198] sm:$0xff] }
 0x12e   : > { %1384 = vmatpush.msrb.mxu0 %v447_v42  ;;  %1403 = vmatpush.msrb.mxu1 %v498_v43  ;;  %v1737_v41 = vld [vmem:[%s2027_s23 + $0x38] sm:$0xff]  ;;  %v645_v42 = vld [vmem:[#allocation5 + $0xce8] sm:$0xff]  ;;  %v696_v43 = vld [vmem:[#allocation5 + $0xe80] sm:$0xff] }
 0x12f   : > { %1424 = vmatpush.msrb.mxu2 %v543_v44  ;;  %1443 = vmatpush.msrb.mxu3 %v594_v45  ;;  %v741_v44 = vld [vmem:[#allocation5 + $0xfe8] sm:$0xff]  ;;  %v792_v45 = vld [vmem:[#allocation5 + $0x1180] sm:$0xff] }
 0x130   : > { %1385 = vmatpush.msrb.mxu0 %v444_v46  ;;  %1404 = vmatpush.msrb.mxu1 %v495_v47  ;;  %v1738_v46 = vld [vmem:[%s2027_s23 + $0x28] sm:$0xff]  ;;  %v642_v47 = vld [vmem:[#allocation5 + $0xcd0] sm:$0xff] }
 0x131   : > { %1425 = vmatpush.msrb.mxu2 %v540_v48  ;;  %1444 = vmatpush.msrb.mxu3 %v591_v49  ;;  %v693_v48 = vld [vmem:[#allocation5 + $0xe68] sm:$0xff]  ;;  %v738_v49 = vld [vmem:[#allocation5 + $0xfd0] sm:$0xff] }
 0x132   : > { %1386 = vmatpush.msrb.mxu0 %v441_v50  ;;  %1405 = vmatpush.msrb.mxu1 %v492_v51  ;;  %v789_v50 = vld [vmem:[#allocation5 + $0x1168] sm:$0xff]  ;;  %v639_v51 = vld [vmem:[#allocation5 + $0xcb8] sm:$0xff] }
 0x133   : > { %1426 = vmatpush.msrb.mxu2 %v537_v52  ;;  %1445 = vmatpush.msrb.mxu3 %v588_v62  ;;  %v690_v52 = vld [vmem:[#allocation5 + $0xe50] sm:$0xff]  ;;  %v735_v62 = vld [vmem:[#allocation5 + $0xfb8] sm:$0xff] }
 0x134   : > { %1387 = vmatpush.msrb.mxu0 %v438_v63  ;;  %1406 = vmatpush.msrb.mxu1 %v489_v53  ;;  %v786_v63 = vld [vmem:[#allocation5 + $0x1150] sm:$0xff]  ;;  %v636_v53 = vld [vmem:[#allocation5 + $0xca0] sm:$0xff] }
 0x135   : > { %1427 = vmatpush.msrb.mxu2 %v534_v54  ;;  %1446 = vmatpush.msrb.mxu3 %v585_v55  ;;  %v687_v54 = vld [vmem:[#allocation5 + $0xe38] sm:$0xff]  ;;  %v732_v55 = vld [vmem:[#allocation5 + $0xfa0] sm:$0xff] }
 0x136   : > { %1388 = vmatpush.msrb.mxu0 %v435_v56  ;;  %1407 = vmatpush.msrb.mxu1 %v486_v4  ;;  %v783_v56 = vld [vmem:[#allocation5 + $0x1138] sm:$0xff]  ;;  %v633_v4 = vld [vmem:[#allocation5 + $0xc88] sm:$0xff] }
 0x137   : > { %1428 = vmatpush.msrb.mxu2 %v531_v5  ;;  %1447 = vmatpush.msrb.mxu3 %v582_v57  ;;  %v684_v5 = vld [vmem:[#allocation5 + $0xe20] sm:$0xff]  ;;  %v729_v57 = vld [vmem:[#allocation5 + $0xf88] sm:$0xff] }
 0x138   : > { %1389 = vmatpush.msrb.mxu0 %v432_v58  ;;  %1408 = vmatpush.msrb.mxu1 %v483_v59  ;;  %v780_v58 = vld [vmem:[#allocation5 + $0x1120] sm:$0xff]  ;;  %v630_v59 = vld [vmem:[#allocation5 + $0xc70] sm:$0xff] }
 0x139   : > { %1429 = vmatpush.msrb.mxu2 %v528_v60  ;;  %1448 = vmatpush.msrb.mxu3 %v579_v10  ;;  %v681_v60 = vld [vmem:[#allocation5 + $0xe08] sm:$0xff]  ;;  %v726_v10 = vld [vmem:[#allocation5 + $0xf70] sm:$0xff] }
 0x13a   : > { %1390 = vmatpush.msrb.mxu0 %v429_v11  ;;  %1409 = vmatpush.msrb.mxu1 %v480_v61  ;;  %v777_v11 = vld [vmem:[#allocation5 + $0x1108] sm:$0xff]  ;;  %v627_v61 = vld [vmem:[#allocation5 + $0xc58] sm:$0xff] }
 0x13b   : > { %1430 = vmatpush.msrb.mxu2 %v525_v0  ;;  %1449 = vmatpush.msrb.mxu3 %v576_v1  ;;  %v678_v0 = vld [vmem:[#allocation5 + $0xdf0] sm:$0xff]  ;;  %v723_v1 = vld [vmem:[#allocation5 + $0xf58] sm:$0xff] }
 0x13c   : > { %1391 = vmatpush.msrb.mxu0 %v426_v2  ;;  %1410 = vmatpush.msrb.mxu1 %v477_v3  ;;  %v774_v2 = vld [vmem:[#allocation5 + $0x10f0] sm:$0xff]  ;;  %v811_v3 = vperm.slane %v2093_v27, 1 }
 0x13d   : > { %1431 = vmatpush.msrb.mxu2 %v522_v16  ;;  %1450 = vmatpush.msrb.mxu3 %v573_v17  ;;  %v624_v16 = vld [vmem:[#allocation5 + $0xc40] sm:$0xff]  ;;  %v675_v17 = vld [vmem:[#allocation5 + $0xdd8] sm:$0xff] }
 0x13e   : > { %1312 = vmatmul.f32.vlgmr.msra.gmra.mxu0 %v1731_v23  ;;  %1352 = vmatmul.f32.vlgmr.msra.gmra.mxu2 %v1732_v24  ;;  %v672_v23 = vld [vmem:[#allocation5 + $0xdc0] sm:$0xff]  ;;  %v717_v24 = vld [vmem:[#allocation5 + $0xf28] sm:$0xff] }
 0x13f   : > { %1456 = vmatpush.msra.mxu0 %v663_v18  ;;  %1496 = vmatpush.msra.mxu2 %v759_v6  ;;  %v720_v6 = vld [vmem:[#allocation5 + $0xf40] sm:$0xff] }
 0x140   : > { %1411 = vmatpush.msrb.mxu1 %v474_v7  ;;  %1451 = vmatpush.msrb.mxu3 %v570_v8  ;;  %v771_v7 = vld [vmem:[#allocation5 + $0x10d8] sm:$0xff]  ;;  %v621_v8 = vld [vmem:[#allocation5 + $0xc28] sm:$0xff] }
 0x141   : > { %1332 = vmatmul.f32.vlgmr.msra.gmra.mxu1 %v1733_v29  ;;  %1372 = vmatmul.f32.vlgmr.msra.gmra.mxu3 %v1734_v15  ;;  %v714_v15 = vld [vmem:[#allocation5 + $0xf10] sm:$0xff] }
 0x142   : > { %1457 = vmatpush.msra.mxu0 %v660_v9  ;;  %1476 = vmatpush.msra.mxu1 %v711_v12  ;;  %v768_v9 = vld [vmem:[#allocation5 + $0x10c0] sm:$0xff] }
 0x143   : > { %1497 = vmatpush.msra.mxu2 %v756_v13  ;;  %1516 = vmatpush.msra.mxu3 %v807_v14  ;;  %v618_v13 = vld [vmem:[#allocation5 + $0xc10] sm:$0xff]  ;;  %v669_v14 = vld [vmem:[#allocation5 + $0xda8] sm:$0xff] }
 0x144   : > { %1458 = vmatpush.msra.mxu0 %v657_v19  ;;  %1477 = vmatpush.msra.mxu1 %v708_v20  ;;  %v765_v19 = vld [vmem:[#allocation5 + $0x10a8] sm:$0xff]  ;;  %v666_v20 = vld [vmem:[#allocation5 + $0xd90] sm:$0xff] }
 0x145   : > { %1498 = vmatpush.msra.mxu2 %v753_v21  ;;  %1517 = vmatpush.msra.mxu3 %v804_v22  ;;  %v762_v21 = vld [vmem:[#allocation5 + $0x1090] sm:$0xff] }
 0x146   : > { %1459 = vmatpush.msra.mxu0 %v654_v25  ;;  %1478 = vmatpush.msra.mxu1 %v705_v26  ;;  %v1739_v26 = vld [vmem:[%s2027_s23 + $0x40] sm:$0xff] }
 0x147   : > { %1499 = vmatpush.msra.mxu2 %v750_v28  ;;  %1518 = vmatpush.msra.mxu3 %v801_v30  ;;  %v1740_v28 = vld [vmem:[%s2027_s23 + $0x50] sm:$0xff]  ;;  %v1741_v30 = vld [vmem:[%s2027_s23 + $0x48] sm:$0xff] }
 0x148   : > { %1432 = vmatmul.f32.vlgmr.msrb.gmra.mxu2 %v1735_v35  ;;  %1460 = vmatpush.msra.mxu0 %v651_v31  ;;  %v1742_v31 = vld [vmem:[%s2027_s23 + $0x58] sm:$0xff] }
 0x149   : > { %1479 = vmatpush.msra.mxu1 %v702_v32  ;;  %1500 = vmatpush.msra.mxu2 %v747_v33 }
 0x14a   : > { %1519 = vmatpush.msra.mxu3 %v798_v34  ;;  %1392 = vmatmul.f32.vlgmr.msrb.gmra.mxu0 %v1736_v39 }
 0x14b   : > { %1452 = vmatmul.f32.vlgmr.msrb.gmra.mxu3 %v1737_v41  ;;  %1461 = vmatpush.msra.mxu0 %v648_v36 }
 0x14c   : > { %1480 = vmatpush.msra.mxu1 %v699_v37  ;;  %1501 = vmatpush.msra.mxu2 %v744_v38 }
 0x14d   : > { %1520 = vmatpush.msra.mxu3 %v795_v40  ;;  %1412 = vmatmul.f32.vlgmr.msrb.gmra.mxu1 %v1738_v46 }
 0x14e   : > { %1462 = vmatpush.msra.mxu0 %v645_v42  ;;  %1481 = vmatpush.msra.mxu1 %v696_v43 }
 0x14f   : > { %1502 = vmatpush.msra.mxu2 %v741_v44  ;;  %1521 = vmatpush.msra.mxu3 %v792_v45 }
 0x150   : > { %1463 = vmatpush.msra.mxu0 %v642_v47  ;;  %1482 = vmatpush.msra.mxu1 %v693_v48 }
 0x151   : > { %1503 = vmatpush.msra.mxu2 %v738_v49  ;;  %1522 = vmatpush.msra.mxu3 %v789_v50 }
 0x152   : > { %1464 = vmatpush.msra.mxu0 %v639_v51  ;;  %1483 = vmatpush.msra.mxu1 %v690_v52  ;;  %v812_v51 = vperm.slane %v2093_v27, 2 }
 0x153   : > { %1504 = vmatpush.msra.mxu2 %v735_v62  ;;  %1523 = vmatpush.msra.mxu3 %v786_v63 }
 0x154   : > { %1465 = vmatpush.msra.mxu0 %v636_v53  ;;  %1484 = vmatpush.msra.mxu1 %v687_v54 }
 0x155   : > { %1505 = vmatpush.msra.mxu2 %v732_v55  ;;  %1524 = vmatpush.msra.mxu3 %v783_v56  ;;  %v1073_v18 = vpop.f32.mrf.mxu0 }
 0x156   : > { %1466 = vmatpush.msra.mxu0 %v633_v4  ;;  %1485 = vmatpush.msra.mxu1 %v684_v5  ;;  %v1074_v12 = vadd.f32 %v1073_v18, %v811_v3 }
 0x157   : > { %1506 = vmatpush.msra.mxu2 %v729_v57  ;;  %1525 = vmatpush.msra.mxu3 %v780_v58 }
 0x158   : > { %1467 = vmatpush.msra.mxu0 %v630_v59  ;;  %1486 = vmatpush.msra.mxu1 %v681_v60  ;;  %v1093_v29 = vpop.f32.mrf.mxu1 }
 0x159   : > { %1507 = vmatpush.msra.mxu2 %v726_v10  ;;  %1526 = vmatpush.msra.mxu3 %v777_v11  ;;  %v1094_v22 = vadd.f32 %v1093_v29, %v1074_v12 }
 0x15a   : > { %1468 = vmatpush.msra.mxu0 %v627_v61  ;;  %1487 = vmatpush.msra.mxu1 %v678_v0 }
 0x15b   : > { %1508 = vmatpush.msra.mxu2 %v723_v1  ;;  %1527 = vmatpush.msra.mxu3 %v774_v2  ;;  %v1113_v25 = vpop.f32.mrf.mxu2 }
 0x15c   : > { %1469 = vmatpush.msra.mxu0 %v624_v16  ;;  %1488 = vmatpush.msra.mxu1 %v675_v17  ;;  %v1114_v32 = vadd.f32 %v1113_v25, %v1094_v22 }
 0x15d   : > { %1509 = vmatpush.msra.mxu2 %v720_v6  ;;  %1528 = vmatpush.msra.mxu3 %v771_v7 }
 0x15e   : > { %1470 = vmatpush.msra.mxu0 %v621_v8  ;;  %1489 = vmatpush.msra.mxu1 %v672_v23  ;;  %v1133_v33 = vpop.f32.mrf.mxu3 }
 0x15f   : > { %1510 = vmatpush.msra.mxu2 %v717_v24  ;;  %1529 = vmatpush.msra.mxu3 %v768_v9  ;;  %v1134_v34 = vadd.f32 %v1133_v33, %v1114_v32 }
 0x160   : > { %1471 = vmatpush.msra.mxu0 %v618_v13  ;;  %1490 = vmatpush.msra.mxu1 %v669_v14 }
 0x161   : > { %1511 = vmatpush.msra.mxu2 %v714_v15  ;;  %1530 = vmatpush.msra.mxu3 %v765_v19  ;;  %v1153_v35 = vpop.f32.mrf.mxu0 }
 0x162   : > { %1472 = vmatmul.f32.vlgmr.msra.gmra.mxu0 %v1739_v26  ;;  %1512 = vmatmul.f32.vlgmr.msra.gmra.mxu2 %v1740_v28  ;;  %v1154_v36 = vadd.f32 %v1153_v35, %v1134_v34 }
 0x163   : > { %1491 = vmatpush.msra.mxu1 %v666_v20  ;;  %1531 = vmatpush.msra.mxu3 %v762_v21 }
 0x164   : > { %1492 = vmatmul.f32.vlgmr.msra.gmra.mxu1 %v1741_v30  ;;  %1532 = vmatmul.f32.vlgmr.msra.gmra.mxu3 %v1742_v31  ;;  %v1173_v37 = vpop.f32.mrf.mxu1 }
 0x165   : > { %v1174_v38 = vadd.f32 %v1173_v37, %v1154_v36  ;;  %v1193_v39 = vpop.f32.mrf.mxu2 }
 0x167   : > { %v1194_v40 = vadd.f32 %v1193_v39, %v1174_v38 }
 0x168   : > { %v1213_v41 = vpop.f32.mrf.mxu3 }
 0x169   : > { %v1214_v42 = vadd.f32 %v1213_v41, %v1194_v40 }
 0x179   : > { %v1233_v43 = vpop.f32.mrf.mxu0 }
 0x17a   : > { %v1234_v44 = vadd.f32 %v1233_v43, %v1214_v42 }
 0x17c   : > { %v1253_v45 = vpop.f32.mrf.mxu1 }
 0x17d   : > { %v1254_v46 = vadd.f32 %v1253_v45, %v1234_v44 }
 0x17f   : > { %v1273_v47 = vpop.f32.mrf.mxu2 }
 0x180   : > { %v1274_v48 = vadd.f32 %v1273_v47, %v1254_v46 }
 0x182   : > { %v1293_v49 = vpop.f32.mrf.mxu3 }
 0x183   : > { %v1294_v50 = vadd.f32 %v1293_v49, %v1274_v48 }
 0x185   : > { %1537 = vst [vmem:[%s2103_s8 + $0x8] sm:$0xff] %v1294_v50 }
 0x1bb   : > { %v1313_v52 = vpop.f32.mrf.mxu0 }
 0x1bc   : > { %v1314_v62 = vadd.f32 %v1313_v52, %v812_v51 }
 0x1be   : > { %v1333_v63 = vpop.f32.mrf.mxu1 }
 0x1bf   : > { %v1334_v53 = vadd.f32 %v1333_v63, %v1314_v62 }
 0x1c1   : > { %v1353_v54 = vpop.f32.mrf.mxu2 }
 0x1c2   : > { %v1354_v55 = vadd.f32 %v1353_v54, %v1334_v53 }
 0x1c4   : > { %v1373_v56 = vpop.f32.mrf.mxu3 }
 0x1c5   : > { %v1374_v4 = vadd.f32 %v1373_v56, %v1354_v55 }
 0x1c7   : > { %v1393_v5 = vpop.f32.mrf.mxu0 }
 0x1c8   : > { %v1394_v57 = vadd.f32 %v1393_v5, %v1374_v4 }
 0x1ca   : > { %v1413_v58 = vpop.f32.mrf.mxu1 }
 0x1cb   : > { %v1414_v59 = vadd.f32 %v1413_v58, %v1394_v57  ;;  %v1433_v60 = vpop.f32.mrf.mxu2 }
 0x1cd   : > { %v1434_v10 = vadd.f32 %v1433_v60, %v1414_v59 }
 0x1ce   : > { %v1453_v11 = vpop.f32.mrf.mxu3 }
 0x1cf   : > { %v1454_v61 = vadd.f32 %v1453_v11, %v1434_v10 }
 0x1df   : > { %v1473_v27 = vpop.f32.mrf.mxu0 }
 0x1e0   : > { %v1474_v0 = vadd.f32 %v1473_v27, %v1454_v61 }
 0x1e1   : > { %v1493_v1 = vpop.f32.mrf.mxu1 }
 0x1e2   : > { %v1494_v2 = vadd.f32 %v1493_v1, %v1474_v0 }
 0x1e5   : > { %v1513_v3 = vpop.f32.mrf.mxu2 }
 0x1e6   : > { %v1514_v16 = vadd.f32 %v1513_v3, %v1494_v2 }
 0x1e7   : > { %v1533_v17 = vpop.f32.mrf.mxu3 }
 0x1e8   : > { %v1534_v18 = vadd.f32 %v1533_v17, %v1514_v16 }
 0x1ea   : > { %1538 = vst [vmem:[%s2103_s8 + $0x10] sm:$0xff] %v1534_v18 }
 0x1eb   : > { %1860 = shalt.err (!%p1857_p9)
}
 0x1ec   : > { %1672 = dma.vmem_to_hbm [thread:$0]  (%p1994_p4), %s1554_s27, 384, %s1556_s28, %s1540_s29  }
 0x1ed PF: > { %s1567_s9 = sand.u32 1, %s1891_s12   ;;  %p2165_p10 = scmp.ge.s32.totalorder %s1903_s15, 2 }
 0x1ee   : > { %s1568_s22 = scalar_lea.sflag [#allocation4], %s1567_s9 }
 0x1ef   : > { %p1686_p11 = pnand %p2165_p10, %p1998_p6 }
 0x1f1   : > { %p1687_p13 = pneg %p1686_p11 }
 0x1f3   : > { %1886 = dma.done.wait (%p1687_p13), %s1568_s22, 384  }
 0x1f4   : > { %1888 = vsyncadd (%p1687_p13), %s1568_s22, 4294966912  ;;  %p17_p0 = scmp.ge.s32.totalorder %s1972_s4, 4   ;;  %s2166_s12 = smov %s1895_s13 }
 0x1f5   : > { %s2167_s13 = smov %s1899_s14  ;;  %s2168_s14 = smov %s1983_s7 }
 0x1f6   : > { %s2169_s15 = smov %s1972_s4  ;;  %19 = sbr.rel (!%p17_p0) target bundleno = 6 (0x6), region = 85 }
 0x1fb   :  { %1574 = vsyncpa [#allocation3], 1 }
 0x1fc   :  { %1576 = vsyncpa [#allocation3 + $0x1], 1 }
 0x1fd   :  { %1577 = vsyncpa [#allocation6], 1 }
 0x1fe   :  { %1578 = vsyncpa [#allocation4], 1 }
 0x1ff   :  { %1580 = vsyncpa [#allocation4 + $0x1], 1 }

</bundles_post_ra>
